<compile_context>
chip_gen: v6e
topology: v6e:2x2x1
jax: 0.10.0
libtpu: 0.0.40
codegen_flags: <defaults>
</compile_context>

<pallas_src>
import jax
import jax.numpy as jnp
from jax.experimental import pallas as pl
from jax.experimental.pallas import tpu as pltpu


def _round_up(n, m):
    return (n + m - 1) // m * m


def _cdiv(a, b):
    return -(-a // b)


def dhnn_kernel(xt_ref, w1_ref, b1_ref, w2_ref, b2_ref, w2bt_ref, wgt_ref, o_ref):
    """Fused D+H forward + analytic input-gradient + folded symplectic rotation.

    Batch is on the lane axis: every activation is (HP, TILE_B) float32.
    """
    x = xt_ref[...].astype(jnp.float32)                                   # (din, TB)

    # ---- forward through the stacked (D | H) MLP ----
    z1 = jnp.dot(w1_ref[...], x, preferred_element_type=jnp.float32) + b1_ref[...]
    h1 = jnp.tanh(z1)                                                     # (HP, TB)

    mm_dtype = w2_ref.dtype  # f32, or bf16 when precision-gated fast path is on
    z2 = jnp.dot(w2_ref[...], h1.astype(mm_dtype),
                 preferred_element_type=jnp.float32) + b2_ref[...]
    h2 = jnp.tanh(z2)                                                     # (HP, TB)

    # ---- backward of sum(w3^T h2) w.r.t. x (per batch column) ----
    # w3 is folded into w2bt on the host: W2BT @ (1-h2^2) == W2^T (w3*(1-h2^2))
    g2 = 1.0 - h2 * h2                                                    # (HP, TB)
    g1 = (1.0 - h1 * h1) * jnp.dot(w2bt_ref[...], g2.astype(mm_dtype),
                                   preferred_element_type=jnp.float32)    # (HP, TB)

    # wgt already has J folded into its H half -> this is irr + rot@J directly
    o_ref[...] = jnp.dot(wgt_ref[...], g1,
                         preferred_element_type=jnp.float32).astype(o_ref.dtype)


def _device_kind():
    try:
        return jax.devices()[0].device_kind.lower()
    except Exception:
        return ""


def dhnn_forward(x, params_d, params_h, *, tile_b=None,
                 hidden_matmul_dtype=jnp.float32):
    """DHNN.forward (as_separate=False) for x of shape (B, input_dim)."""
    B, din = x.shape
    assert din % 2 == 0, "input_dim must be even (q|p split)"
    d = din // 2
    w1d, b1d, w2d, b2d, w3d = params_d
    w1h, b1h, w2h, b2h, w3h = params_h
    H = w1d.shape[0]
    HP = _round_up(2 * H, 128)            # stacked hidden, padded to lane width
    f32 = jnp.float32

    # ---------------- host-side (one-time) weight preparation ----------------
    # J = [[0, -I], [I, 0]] : rot_component = rot @ J (swap halves + sign flip)
    eye = jnp.eye(d, dtype=f32)
    zer = jnp.zeros((d, d), dtype=f32)
    J = jnp.block([[zer, -eye], [eye, zer]])                              # (din, din)

    def pad_rows(a, rows):
        a = a.astype(f32)
        return jnp.zeros((rows,) + a.shape[1:], f32).at[: a.shape[0]].set(a)

    # stacked, zero-padded weights (D block first, H block second). Zero pad
    # rows/cols contribute exactly nothing (tanh(0)=0, zero w2/w3 entries).
    W1 = pad_rows(jnp.concatenate([w1d, w1h], axis=0), HP)                # (HP, din)
    B1 = pad_rows(jnp.concatenate([b1d.reshape(-1, 1), b1h.reshape(-1, 1)], 0), HP)
    W2 = jnp.zeros((HP, HP), f32)
    W2 = W2.at[:H, :H].set(w2d.astype(f32)).at[H:2 * H, H:2 * H].set(w2h.astype(f32))
    B2 = pad_rows(jnp.concatenate([b2d.reshape(-1, 1), b2h.reshape(-1, 1)], 0), HP)
    W3 = pad_rows(jnp.concatenate([w3d.reshape(-1, 1), w3h.reshape(-1, 1)], 0), HP)
    # backward weight with w3 folded in (review item 1):
    #   W2BT @ (1 - h2^2)  ==  W2^T (w3 * (1 - h2^2))
    W2BT = W2.T * W3[:, 0][None, :]                                       # (HP, HP)
    # final gradient projection, J folded into the H half:
    #   out_col = w1d^T g1_d + (w1h @ J)^T g1_h = irr + rot@J
    WG = pad_rows(jnp.concatenate([w1d, w1h @ J], axis=0), HP)            # (HP, din)
    WGT = WG.T                                                            # (din, HP)

    # precision-gated: bf16 operands for the two HPxHP MXU matmuls
    mmdt = jnp.dtype(hidden_matmul_dtype)
    W2 = W2.astype(mmdt)
    W2BT = W2BT.astype(mmdt)

    # ---------------- per-generation tile selection ----------------
    kind = _device_kind()
    is_v7 = "v7" in kind
    vmem_budget = (24 if is_v7 else 80) * (1 << 20)   # working budget for tiling
    vmem_limit = (48 if is_v7 else 100) * (1 << 20)   # scoped limit (headroom kept)
    hard_cap = 2048 if is_v7 else 4096

    weight_bytes = ((W1.size + B1.size + B2.size + WGT.size) * 4
                    + (W2.size + W2BT.size) * W2.dtype.itemsize)
    # ~6 live (HP, TB) f32 temporaries + double-buffered in/out (din, TB) blocks
    bytes_per_col = 4 * (6 * HP + 4 * din)
    fit = max(128, (vmem_budget - 2 * weight_bytes) // bytes_per_col)
    cap = max(128, min(hard_cap, (fit // 128) * 128))
    if tile_b is not None:
        cap = max(128, min(cap, _round_up(int(tile_b), 128)))

    # pad batch only to 128 and split into near-equal 128-multiple tiles so
    # padding waste stays ~<=128 columns per step (review item 8)
    B128 = _round_up(B, 128)
    steps = _cdiv(B128, cap)
    if is_v7 and B128 >= 256:
        steps = max(steps, 2)     # keep both v7x TensorCores busy (review item 6)
    tb = _round_up(_cdiv(B128, steps), 128)
    grid0 = _cdiv(B128, tb)
    B_pad = grid0 * tb

    # batch on the lane axis: feed x transposed, zero-padded (zeros are benign)
    xt = jnp.zeros((din, B_pad), f32).at[:, :B].set(x.astype(f32).T)

    # advisory cost model for XLA scheduling (review item 10)
    flops = int(grid0 * tb * (4 * HP * HP + 4 * HP * din))
    transcendentals = int(grid0 * tb * 2 * HP)
    bytes_accessed = int(xt.size * 4 + din * B_pad * 4 + weight_bytes)
    cost = pl.CostEstimate(flops=flops, transcendentals=transcendentals,
                           bytes_accessed=bytes_accessed)

    args = (xt, W1, B1, W2, B2, W2BT, WGT)

    def build_and_run(single_buffer_weights):
        def wspec(shape):
            idx = lambda i: (0,) * len(shape)
            if single_buffer_weights:
                # constant-index weights never change across the grid: one buffer
                return pl.BlockSpec(shape, idx, pipeline_mode=pl.Buffered(1))
            return pl.BlockSpec(shape, idx)

        return pl.pallas_call(
            dhnn_kernel,
            out_shape=jax.ShapeDtypeStruct((din, B_pad), x.dtype),
            grid=(grid0,),
            in_specs=[
                pl.BlockSpec((din, tb), lambda i: (0, i)),   # x^T batch tile
                wspec(W1.shape), wspec(B1.shape), wspec(W2.shape),
                wspec(B2.shape), wspec(W2BT.shape), wspec(WGT.shape),
            ],
            out_specs=pl.BlockSpec((din, tb), lambda i: (0, i)),
            compiler_params=pltpu.CompilerParams(
                dimension_semantics=("parallel",),
                vmem_limit_bytes=int(vmem_limit)),
            cost_estimate=cost,
        )(*args)

    try:
        out_t = build_and_run(True)        # single-buffered resident weights
    except Exception:
        out_t = build_and_run(False)       # fallback: default double buffering

    return out_t.T[:B]


# ---------------- parameter construction & pure-JAX reference ----------------

def make_mlp_params(key, input_dim, hidden_dim):
    k1, k2, k3, k4, k5 = jax.random.split(key, 5)
    w1 = jax.random.normal(k1, (hidden_dim, input_dim), jnp.float32) / jnp.sqrt(input_dim)
    b1 = jax.random.normal(k2, (1, hidden_dim), jnp.float32) * 0.1
    w2 = jax.random.normal(k3, (hidden_dim, hidden_dim), jnp.float32) / jnp.sqrt(hidden_dim)
    b2 = jax.random.normal(k4, (1, hidden_dim), jnp.float32) * 0.1
    w3 = jax.random.normal(k5, (1, hidden_dim), jnp.float32) / jnp.sqrt(hidden_dim)
    return (w1, b1, w2, b2, w3)


def _mlp_apply(params, x):
    w1, b1, w2, b2, w3 = params
    h1 = jnp.tanh(x @ w1.T + b1[0])
    h2 = jnp.tanh(h1 @ w2.T + b2[0])
    return h2 @ w3.T                                                      # (B, 1)


def ref_forward(x, params_d, params_h):
    irr = jax.grad(lambda xx: _mlp_apply(params_d, xx).sum())(x)
    rot = jax.grad(lambda xx: _mlp_apply(params_h, xx).sum())(x)
    d = x.shape[-1] // 2
    dHdq, dHdp = rot[:, :d], rot[:, d:]
    return jnp.concatenate([dHdp, -dHdq], axis=-1) + irr


if __name__ == "__main__":
    input_dim, hidden_dim = 4, 32

    key = jax.random.PRNGKey(0)
    kx, kd, kh, kx2 = jax.random.split(key, 4)
    params_d = make_mlp_params(kd, input_dim, hidden_dim)
    params_h = make_mlp_params(kh, input_dim, hidden_dim)

    # small batch, full f32 path
    x = jax.random.normal(kx, (8, input_dim), jnp.float32)
    out = jax.block_until_ready(dhnn_forward(x, params_d, params_h))
    ref = ref_forward(x, params_d, params_h)
    assert out.shape == (8, input_dim)
    assert jnp.allclose(out, ref, atol=1e-4, rtol=1e-4), "f32 mismatch vs autodiff"

    # multi-step batch grid (tile cap forces >1 grid step), f32
    x2 = jax.random.normal(kx2, (300, input_dim), jnp.float32)
    out2 = jax.block_until_ready(dhnn_forward(x2, params_d, params_h, tile_b=128))
    ref2 = ref_forward(x2, params_d, params_h)
    assert out2.shape == (300, input_dim)
    assert jnp.allclose(out2, ref2, atol=1e-4, rtol=1e-4), "multi-tile mismatch"

    # precision-gated fast path: bf16 operands for the two HPxHP MXU matmuls
    out_bf = jax.block_until_ready(
        dhnn_forward(x, params_d, params_h, hidden_matmul_dtype=jnp.bfloat16))
    assert jnp.allclose(out_bf, ref, atol=1.5e-1, rtol=1.5e-1), "bf16 path off"

    print("KERNEL_OK")
</pallas_src>

<mosaic_0001>
module attributes {stable_mosaic.version = 11 : i64} {
  func.func @dhnn_kernel(%arg0: i32, %arg1: memref<4x128xf32, #tpu.memory_space<vmem>>, %arg2: memref<128x4xf32, #tpu.memory_space<vmem>>, %arg3: memref<128x1xf32, #tpu.memory_space<vmem>>, %arg4: memref<128x128xf32, #tpu.memory_space<vmem>>, %arg5: memref<128x1xf32, #tpu.memory_space<vmem>>, %arg6: memref<128x128xf32, #tpu.memory_space<vmem>>, %arg7: memref<4x128xf32, #tpu.memory_space<vmem>>, %arg8: memref<4x128xf32, #tpu.memory_space<vmem>>) attributes {dimension_semantics = [#tpu.dimension_semantics<parallel>], iteration_bounds = array<i64: 1>, scalar_prefetch = 0 : i64, scratch_operands = 0 : i64, tpu.core_type = #tpu.core_type<tc>, window_params = [{transform_indices = @transform_0, window_bounds = array<i64: 4, 128>}, {pipeline_mode = #tpu.pipeline_mode<synchronous>, transform_indices = @transform_1, window_bounds = array<i64: 128, 4>}, {pipeline_mode = #tpu.pipeline_mode<synchronous>, transform_indices = @transform_2, window_bounds = array<i64: 128, 1>}, {pipeline_mode = #tpu.pipeline_mode<synchronous>, transform_indices = @transform_3, window_bounds = array<i64: 128, 128>}, {pipeline_mode = #tpu.pipeline_mode<synchronous>, transform_indices = @transform_4, window_bounds = array<i64: 128, 1>}, {pipeline_mode = #tpu.pipeline_mode<synchronous>, transform_indices = @transform_5, window_bounds = array<i64: 128, 128>}, {pipeline_mode = #tpu.pipeline_mode<synchronous>, transform_indices = @transform_6, window_bounds = array<i64: 4, 128>}, {transform_indices = @transform_7, window_bounds = array<i64: 4, 128>}]} {
    %c0 = arith.constant 0 : index
    %c0_0 = arith.constant 0 : index
    %0 = vector.load %arg1[%c0, %c0_0] : memref<4x128xf32, #tpu.memory_space<vmem>>, vector<4x128xf32>
    %c0_1 = arith.constant 0 : index
    %c0_2 = arith.constant 0 : index
    %1 = vector.load %arg2[%c0_1, %c0_2] : memref<128x4xf32, #tpu.memory_space<vmem>>, vector<128x4xf32>
    %cst = arith.constant dense<0.000000e+00> : vector<128x128xf32>
    %2 = tpu.matmul %1, %0, %cst {dimension_numbers = #tpu.dot_dimension_numbers<[1], [0], [0], [1], [0, 0, 1, 1], [], []>} : vector<128x4xf32>, vector<4x128xf32>, vector<128x128xf32> -> vector<128x128xf32>
    %c0_3 = arith.constant 0 : index
    %c0_4 = arith.constant 0 : index
    %3 = vector.load %arg3[%c0_3, %c0_4] : memref<128x1xf32, #tpu.memory_space<vmem>>, vector<128x1xf32>
    %4 = vector.broadcast %3 : vector<128x1xf32> to vector<128x128xf32>
    %5 = arith.addf %2, %4 : vector<128x128xf32>
    %6 = math.tanh %5 : vector<128x128xf32>
    %c0_5 = arith.constant 0 : index
    %c0_6 = arith.constant 0 : index
    %7 = vector.load %arg4[%c0_5, %c0_6] : memref<128x128xf32, #tpu.memory_space<vmem>>, vector<128x128xf32>
    %cst_7 = arith.constant dense<0.000000e+00> : vector<128x128xf32>
    %8 = tpu.matmul %7, %6, %cst_7 {dimension_numbers = #tpu.dot_dimension_numbers<[1], [0], [0], [1], [0, 0, 1, 1], [], []>} : vector<128x128xf32>, vector<128x128xf32>, vector<128x128xf32> -> vector<128x128xf32>
    %c0_8 = arith.constant 0 : index
    %c0_9 = arith.constant 0 : index
    %9 = vector.load %arg5[%c0_8, %c0_9] : memref<128x1xf32, #tpu.memory_space<vmem>>, vector<128x1xf32>
    %10 = vector.broadcast %9 : vector<128x1xf32> to vector<128x128xf32>
    %11 = arith.addf %8, %10 : vector<128x128xf32>
    %12 = math.tanh %11 : vector<128x128xf32>
    %13 = arith.mulf %12, %12 : vector<128x128xf32>
    %cst_10 = arith.constant 1.000000e+00 : f32
    %14 = vector.broadcast %cst_10 : f32 to vector<128x128xf32>
    %15 = arith.subf %14, %13 : vector<128x128xf32>
    %16 = arith.mulf %6, %6 : vector<128x128xf32>
    %cst_11 = arith.constant 1.000000e+00 : f32
    %17 = vector.broadcast %cst_11 : f32 to vector<128x128xf32>
    %18 = arith.subf %17, %16 : vector<128x128xf32>
    %c0_12 = arith.constant 0 : index
    %c0_13 = arith.constant 0 : index
    %19 = vector.load %arg6[%c0_12, %c0_13] : memref<128x128xf32, #tpu.memory_space<vmem>>, vector<128x128xf32>
    %cst_14 = arith.constant dense<0.000000e+00> : vector<128x128xf32>
    %20 = tpu.matmul %19, %15, %cst_14 {dimension_numbers = #tpu.dot_dimension_numbers<[1], [0], [0], [1], [0, 0, 1, 1], [], []>} : vector<128x128xf32>, vector<128x128xf32>, vector<128x128xf32> -> vector<128x128xf32>
    %21 = arith.mulf %18, %20 : vector<128x128xf32>
    %c0_15 = arith.constant 0 : index
    %c0_16 = arith.constant 0 : index
    %22 = vector.load %arg7[%c0_15, %c0_16] : memref<4x128xf32, #tpu.memory_space<vmem>>, vector<4x128xf32>
    %cst_17 = arith.constant dense<0.000000e+00> : vector<4x128xf32>
    %23 = tpu.matmul %22, %21, %cst_17 {dimension_numbers = #tpu.dot_dimension_numbers<[1], [0], [0], [1], [0, 0, 1, 1], [], []>} : vector<4x128xf32>, vector<128x128xf32>, vector<4x128xf32> -> vector<4x128xf32>
    %c0_18 = arith.constant 0 : index
    %c0_19 = arith.constant 0 : index
    %24 = vector.load %arg8[%c0_18, %c0_19] : memref<4x128xf32, #tpu.memory_space<vmem>>, vector<4x128xf32>
    tpu.vector_store %arg8[%c0_18, %c0_19], %23 {strides = array<i32>} : memref<4x128xf32, #tpu.memory_space<vmem>>, vector<4x128xf32>,
    return
  }
  func.func @transform_0(%arg0: i32) -> (i32, i32) {
    %c0_i32 = arith.constant 0 : i32
    %c0_i32_0 = arith.constant 0 : i32
    return %c0_i32, %arg0 : i32, i32
  }
  func.func @transform_1(%arg0: i32) -> (i32, i32) {
    %c0_i32 = arith.constant 0 : i32
    %c0_i32_0 = arith.constant 0 : i32
    %c0_i32_1 = arith.constant 0 : i32
    return %c0_i32, %c0_i32_0 : i32, i32
  }
  func.func @transform_2(%arg0: i32) -> (i32, i32) {
    %c0_i32 = arith.constant 0 : i32
    %c0_i32_0 = arith.constant 0 : i32
    %c0_i32_1 = arith.constant 0 : i32
    return %c0_i32, %c0_i32_0 : i32, i32
  }
  func.func @transform_3(%arg0: i32) -> (i32, i32) {
    %c0_i32 = arith.constant 0 : i32
    %c0_i32_0 = arith.constant 0 : i32
    %c0_i32_1 = arith.constant 0 : i32
    return %c0_i32, %c0_i32_0 : i32, i32
  }
  func.func @transform_4(%arg0: i32) -> (i32, i32) {
    %c0_i32 = arith.constant 0 : i32
    %c0_i32_0 = arith.constant 0 : i32
    %c0_i32_1 = arith.constant 0 : i32
    return %c0_i32, %c0_i32_0 : i32, i32
  }
  func.func @transform_5(%arg0: i32) -> (i32, i32) {
    %c0_i32 = arith.constant 0 : i32
    %c0_i32_0 = arith.constant 0 : i32
    %c0_i32_1 = arith.constant 0 : i32
    return %c0_i32, %c0_i32_0 : i32, i32
  }
  func.func @transform_6(%arg0: i32) -> (i32, i32) {
    %c0_i32 = arith.constant 0 : i32
    %c0_i32_0 = arith.constant 0 : i32
    %c0_i32_1 = arith.constant 0 : i32
    return %c0_i32, %c0_i32_0 : i32, i32
  }
  func.func @transform_7(%arg0: i32) -> (i32, i32) {
    %c0_i32 = arith.constant 0 : i32
    %c0_i32_0 = arith.constant 0 : i32
    return %c0_i32, %arg0 : i32, i32
  }
}

module attributes {stable_mosaic.version = 11 : i64} {
  func.func @dhnn_kernel(%arg0: i32, %arg1: memref<4x128xf32, #tpu.memory_space<vmem>>, %arg2: memref<128x4xf32, #tpu.memory_space<vmem>>, %arg3: memref<128x1xf32, #tpu.memory_space<vmem>>, %arg4: memref<128x128xf32, #tpu.memory_space<vmem>>, %arg5: memref<128x1xf32, #tpu.memory_space<vmem>>, %arg6: memref<128x128xf32, #tpu.memory_space<vmem>>, %arg7: memref<4x128xf32, #tpu.memory_space<vmem>>, %arg8: memref<4x128xf32, #tpu.memory_space<vmem>>) attributes {dimension_semantics = [#tpu.dimension_semantics<parallel>], iteration_bounds = array<i64: 1>, scalar_prefetch = 0 : i64, scratch_operands = 0 : i64, tpu.core_type = #tpu.core_type<tc>, window_params = [{transform_indices = @transform_0, window_bounds = array<i64: 4, 128>}, {pipeline_mode = #tpu.pipeline_mode<synchronous>, transform_indices = @transform_1, window_bounds = array<i64: 128, 4>}, {pipeline_mode = #tpu.pipeline_mode<synchronous>, transform_indices = @transform_2, window_bounds = array<i64: 128, 1>}, {pipeline_mode = #tpu.pipeline_mode<synchronous>, transform_indices = @transform_3, window_bounds = array<i64: 128, 128>}, {pipeline_mode = #tpu.pipeline_mode<synchronous>, transform_indices = @transform_4, window_bounds = array<i64: 128, 1>}, {pipeline_mode = #tpu.pipeline_mode<synchronous>, transform_indices = @transform_5, window_bounds = array<i64: 128, 128>}, {pipeline_mode = #tpu.pipeline_mode<synchronous>, transform_indices = @transform_6, window_bounds = array<i64: 4, 128>}, {transform_indices = @transform_7, window_bounds = array<i64: 4, 128>}]} {
    %c0 = arith.constant 0 : index
    %c0_0 = arith.constant 0 : index
    %0 = vector.load %arg1[%c0, %c0_0] : memref<4x128xf32, #tpu.memory_space<vmem>>, vector<4x128xf32>
    %c0_1 = arith.constant 0 : index
    %c0_2 = arith.constant 0 : index
    %1 = vector.load %arg2[%c0_1, %c0_2] : memref<128x4xf32, #tpu.memory_space<vmem>>, vector<128x4xf32>
    %cst = arith.constant dense<0.000000e+00> : vector<128x128xf32>
    %2 = tpu.matmul %1, %0, %cst {dimension_numbers = #tpu.dot_dimension_numbers<[1], [0], [0], [1], [0, 0, 1, 1], [], []>} : vector<128x4xf32>, vector<4x128xf32>, vector<128x128xf32> -> vector<128x128xf32>
    %c0_3 = arith.constant 0 : index
    %c0_4 = arith.constant 0 : index
    %3 = vector.load %arg3[%c0_3, %c0_4] : memref<128x1xf32, #tpu.memory_space<vmem>>, vector<128x1xf32>
    %4 = vector.broadcast %3 : vector<128x1xf32> to vector<128x128xf32>
    %5 = arith.addf %2, %4 : vector<128x128xf32>
    %6 = math.tanh %5 : vector<128x128xf32>
    %c0_5 = arith.constant 0 : index
    %c0_6 = arith.constant 0 : index
    %7 = vector.load %arg4[%c0_5, %c0_6] : memref<128x128xf32, #tpu.memory_space<vmem>>, vector<128x128xf32>
    %cst_7 = arith.constant dense<0.000000e+00> : vector<128x128xf32>
    %8 = tpu.matmul %7, %6, %cst_7 {dimension_numbers = #tpu.dot_dimension_numbers<[1], [0], [0], [1], [0, 0, 1, 1], [], []>} : vector<128x128xf32>, vector<128x128xf32>, vector<128x128xf32> -> vector<128x128xf32>
    %c0_8 = arith.constant 0 : index
    %c0_9 = arith.constant 0 : index
    %9 = vector.load %arg5[%c0_8, %c0_9] : memref<128x1xf32, #tpu.memory_space<vmem>>, vector<128x1xf32>
    %10 = vector.broadcast %9 : vector<128x1xf32> to vector<128x128xf32>
    %11 = arith.addf %8, %10 : vector<128x128xf32>
    %12 = math.tanh %11 : vector<128x128xf32>
    %13 = arith.mulf %12, %12 : vector<128x128xf32>
    %cst_10 = arith.constant 1.000000e+00 : f32
    %14 = vector.broadcast %cst_10 : f32 to vector<128x128xf32>
    %15 = arith.subf %14, %13 : vector<128x128xf32>
    %16 = arith.mulf %6, %6 : vector<128x128xf32>
    %cst_11 = arith.constant 1.000000e+00 : f32
    %17 = vector.broadcast %cst_11 : f32 to vector<128x128xf32>
    %18 = arith.subf %17, %16 : vector<128x128xf32>
    %c0_12 = arith.constant 0 : index
    %c0_13 = arith.constant 0 : index
    %19 = vector.load %arg6[%c0_12, %c0_13] : memref<128x128xf32, #tpu.memory_space<vmem>>, vector<128x128xf32>
    %cst_14 = arith.constant dense<0.000000e+00> : vector<128x128xf32>
    %20 = tpu.matmul %19, %15, %cst_14 {dimension_numbers = #tpu.dot_dimension_numbers<[1], [0], [0], [1], [0, 0, 1, 1], [], []>} : vector<128x128xf32>, vector<128x128xf32>, vector<128x128xf32> -> vector<128x128xf32>
    %21 = arith.mulf %18, %20 : vector<128x128xf32>
    %c0_15 = arith.constant 0 : index
    %c0_16 = arith.constant 0 : index
    %22 = vector.load %arg7[%c0_15, %c0_16] : memref<4x128xf32, #tpu.memory_space<vmem>>, vector<4x128xf32>
    %cst_17 = arith.constant dense<0.000000e+00> : vector<4x128xf32>
    %23 = tpu.matmul %22, %21, %cst_17 {dimension_numbers = #tpu.dot_dimension_numbers<[1], [0], [0], [1], [0, 0, 1, 1], [], []>} : vector<4x128xf32>, vector<128x128xf32>, vector<4x128xf32> -> vector<4x128xf32>
    %c0_18 = arith.constant 0 : index
    %c0_19 = arith.constant 0 : index
    %24 = vector.load %arg8[%c0_18, %c0_19] : memref<4x128xf32, #tpu.memory_space<vmem>>, vector<4x128xf32>
    tpu.vector_store %arg8[%c0_18, %c0_19], %23 {strides = array<i32>} : memref<4x128xf32, #tpu.memory_space<vmem>>, vector<4x128xf32>,
    return
  }
  func.func @transform_0(%arg0: i32) -> (i32, i32) {
    %c0_i32 = arith.constant 0 : i32
    %c0_i32_0 = arith.constant 0 : i32
    return %c0_i32, %arg0 : i32, i32
  }
  func.func @transform_1(%arg0: i32) -> (i32, i32) {
    %c0_i32 = arith.constant 0 : i32
    %c0_i32_0 = arith.constant 0 : i32
    %c0_i32_1 = arith.constant 0 : i32
    return %c0_i32, %c0_i32_0 : i32, i32
  }
  func.func @transform_2(%arg0: i32) -> (i32, i32) {
    %c0_i32 = arith.constant 0 : i32
    %c0_i32_0 = arith.constant 0 : i32
    %c0_i32_1 = arith.constant 0 : i32
    return %c0_i32, %c0_i32_0 : i32, i32
  }
  func.func @transform_3(%arg0: i32) -> (i32, i32) {
    %c0_i32 = arith.constant 0 : i32
    %c0_i32_0 = arith.constant 0 : i32
    %c0_i32_1 = arith.constant 0 : i32
    return %c0_i32, %c0_i32_0 : i32, i32
  }
  func.func @transform_4(%arg0: i32) -> (i32, i32) {
    %c0_i32 = arith.constant 0 : i32
    %c0_i32_0 = arith.constant 0 : i32
    %c0_i32_1 = arith.constant 0 : i32
    return %c0_i32, %c0_i32_0 : i32, i32
  }
  func.func @transform_5(%arg0: i32) -> (i32, i32) {
    %c0_i32 = arith.constant 0 : i32
    %c0_i32_0 = arith.constant 0 : i32
    %c0_i32_1 = arith.constant 0 : i32
    return %c0_i32, %c0_i32_0 : i32, i32
  }
  func.func @transform_6(%arg0: i32) -> (i32, i32) {
    %c0_i32 = arith.constant 0 : i32
    %c0_i32_0 = arith.constant 0 : i32
    %c0_i32_1 = arith.constant 0 : i32
    return %c0_i32, %c0_i32_0 : i32, i32
  }
  func.func @transform_7(%arg0: i32) -> (i32, i32) {
    %c0_i32 = arith.constant 0 : i32
    %c0_i32_0 = arith.constant 0 : i32
    return %c0_i32, %arg0 : i32, i32
  }
}

</mosaic_0001>

<bundles_post_ra>
// kernel: tpu_custom_call.1
= control target key start
LH: loop header
LB: loop body
LE: loop exit
PB: predicated region body
PF: predicated region fallthrough
CT: control target
= control target key end

     0   :  { %vm189_vm0 = vcmask 1043456   ;;  %vm140_vm1 = vcmask 31744   ;;  %v1334_v4 = vmov 0   ;;  %s1789_s0 = inlined_call_operand.vmem [shape: f32[4,128], index: 0, kind: input, shape index: {}]   ;;  %s1790_s1 = inlined_call_operand.vmem [shape: f32[128,4], index: 1, kind: input, shape index: {}]   ;;  %s1791_s2 = inlined_call_operand.vmem [shape: f32[128,1], index: 2, kind: input, shape index: {}]   ;;  %s1792_s3 = inlined_call_operand.vmem [shape: f32[128,128], index: 3, kind: input, shape index: {}]   ;;  %s1793_s4 = inlined_call_operand.vmem [shape: f32[128,1], index: 4, kind: input, shape index: {}]   ;;  %s1794_s5 = inlined_call_operand.vmem [shape: f32[128,128], index: 5, kind: input, shape index: {}]   ;;  %s1795_s6 = inlined_call_operand.vmem [shape: f32[4,128], index: 6, kind: input, shape index: {}]   ;;  %s1796_s7 = inlined_call_operand.hbm [shape: f32[4,128], index: 7, kind: output, shape index: {}]  }
   0x1   :  { %v27_v0 = vld [vmem:[%s1789_s0] sm:$0xf]  ;;  %v29_v2 = vld [vmem:[%s1790_s1 + $0x8] sm:$0xff]  ;;  %v30_v3 = vld [vmem:[%s1790_s1 + $0x10] sm:$0xff]  ;;  %1246 = vset.pattern.permute.xlu0 %v1334_v4  ;;  %1247 = vset.pattern.permute.xlu1 %v1334_v4 }
   0x2   :  { %v28_v1 = vld [vmem:[%s1790_s1] sm:$0xff]  ;;  %1069 = vmatprep.subr.msk.mxu0 %vm189_vm0, %v27_v0  ;;  %v31_v5 = vld [vmem:[%s1790_s1 + $0x18] sm:$0xff]  ;;  %v57_v8 = vld [vmem:[%s1791_s2 + $0x68] sm:$0xff] }
   0x3   :  { %1071 = vmatprep.mubr.msk.f32.mxu0 %vm140_vm1, %v28_v1  ;;  %1070 = vmatpush3.msk.msra.mxu0 %vm189_vm0, %v27_v0  ;;  %v32_v6 = vld [vmem:[%s1790_s1 + $0x20] sm:$0xff]  ;;  %v59_v7 = vld [vmem:[%s1791_s2 + $0x78] sm:$0xff]  ;;  %v58_v9 = vld [vmem:[%s1791_s2 + $0x70] sm:$0xff] }
   0x4   :  { %1072 = vmatmul.mubr.msk.f32.vlgmr.msra.gmra.mxu0 %vm140_vm1, %v29_v2  ;;  %137 = vperm.xlu0 %1246, %v59_v7   ;;  %v33_v10 = vld [vmem:[%s1790_s1 + $0x28] sm:$0xff]  ;;  %v56_v11 = vld [vmem:[%s1791_s2 + $0x60] sm:$0xff]  ;;  %v34_v12 = vld [vmem:[%s1790_s1 + $0x30] sm:$0xff] }
   0x5   :  { %1074 = vmatprep.mubr.msk.f32.mxu0 %vm140_vm1, %v30_v3  ;;  %127 = vperm.xlu1 %1247, %v57_v8   ;;  %v55_v13 = vld [vmem:[%s1791_s2 + $0x58] sm:$0xff]  ;;  %v54_v15 = vld [vmem:[%s1791_s2 + $0x50] sm:$0xff]  ;;  %v36_v16 = vld [vmem:[%s1790_s1 + $0x40] sm:$0xff] }
   0x6   :  { %v35_v14 = vld [vmem:[%s1790_s1 + $0x38] sm:$0xff]  ;;  %v53_v17 = vld [vmem:[%s1791_s2 + $0x48] sm:$0xff]  ;;  %v52_v19 = vld [vmem:[%s1791_s2 + $0x40] sm:$0xff] }
   0x7   :  { %v37_v18 = vld [vmem:[%s1790_s1 + $0x48] sm:$0xff] }
   0x8   :  { %1075 = vmatmul.mubr.msk.f32.gmra.mxu0 %vm140_vm1, %v31_v5  ;;  %132 = vperm.xlu0 %1246, %v58_v9  }
   0x9   :  { %1077 = vmatprep.mubr.msk.f32.mxu0 %vm140_vm1, %v32_v6  ;;  %122 = vperm.xlu1 %1247, %v56_v11  }
   0xc   :  { %1078 = vmatmul.mubr.msk.f32.gmra.mxu0 %vm140_vm1, %v33_v10  ;;  %117 = vperm.xlu0 %1246, %v55_v13  }
   0xd   :  { %1080 = vmatprep.mubr.msk.f32.mxu0 %vm140_vm1, %v34_v12  ;;  %112 = vperm.xlu1 %1247, %v54_v15  }
  0x10   :  { %1081 = vmatmul.mubr.msk.f32.gmra.mxu0 %vm140_vm1, %v35_v14 }
  0x11   :  { %1083 = vmatprep.mubr.msk.f32.mxu0 %vm140_vm1, %v36_v16 }
  0x12   :  { %12 = vsyncpa [#allocation3], 0  ;;  %v38_v20 = vld [vmem:[%s1790_s1 + $0x50] sm:$0xff]  ;;  %107 = vperm.xlu0 %1246, %v53_v17   ;;  %102 = vperm.xlu1 %1247, %v52_v19   ;;  %v51_v21 = vld [vmem:[%s1791_s2 + $0x38] sm:$0xff]  ;;  %vm1336_vm2 = vmmov 0   ;;  %s1337_s30 = smov [#allocation2]  }
  0x13   :  { %v39_v22 = vld [vmem:[%s1790_s1 + $0x58] sm:$0xff]  ;;  %v50_v23 = vld [vmem:[%s1791_s2 + $0x30] sm:$0xff]  ;;  %v40_v24 = vld [vmem:[%s1790_s1 + $0x60] sm:$0xff]  ;;  %s946_s8 = sshll.u32 %s1337_s30, 4  ;;  %s947_s8 = int_to_ptr.vmem [resolvable:$true] %s946_s8 }
  0x14   :  { %1084 = vmatmul.mubr.msk.f32.gmra.mxu0 %vm140_vm1, %v37_v18  ;;  %v49_v25 = vld [vmem:[%s1791_s2 + $0x28] sm:$0xff]  ;;  %v48_v27 = vld [vmem:[%s1791_s2 + $0x20] sm:$0xff]  ;;  %v42_v28 = vld [vmem:[%s1790_s1 + $0x70] sm:$0xff]  ;;  %s1312_s0 = scalar_lea.vmem %s947_s8, 64  ;;  %p1317_p1 = scmp.lt.s32.totalorder %s947_s8, %s947_s8 }
  0x15   :  { %1086 = vmatprep.mubr.msk.f32.mxu0 %vm140_vm1, %v38_v20  ;;  %v41_v26 = vld [vmem:[%s1790_s1 + $0x68] sm:$0xff]  ;;  %v47_v29 = vld [vmem:[%s1791_s2 + $0x18] sm:$0xff]  ;;  %v46_v31 = vld [vmem:[%s1791_s2 + $0x10] sm:$0xff]  ;;  %p1313_p0 = scmp.ne.s32.totalorder %s947_s8, %s1312_s0  ;;  %p1318_p2 = scmp.lt.s32.totalorder %s1312_s0, %s1312_s0 }
  0x16   :  { %97 = vperm.xlu0 %1246, %v51_v21   ;;  %92 = vperm.xlu1 %1247, %v50_v23   ;;  %v43_v30 = vld [vmem:[%s1790_s1 + $0x78] sm:$0xff]  ;;  %v45_v32 = vld [vmem:[%s1791_s2 + $0x8] sm:$0xff]  ;;  %v44_v33 = vld [vmem:[%s1791_s2] sm:$0xff] }
  0x17   :  { %v385_v34 = vld [vmem:[%s1793_s4 + $0x78] sm:$0xff]  ;;  %v384_v35 = vld [vmem:[%s1793_s4 + $0x70] sm:$0xff]  ;;  %v383_v36 = vld [vmem:[%s1793_s4 + $0x68] sm:$0xff]  ;;  %p1319_p3 = por %p1318_p2, %p1317_p1 }
  0x18   :  { %1087 = vmatmul.mubr.msk.f32.gmra.mxu0 %vm140_vm1, %v39_v22  ;;  %v382_v37 = vld [vmem:[%s1793_s4 + $0x60] sm:$0xff]  ;;  %v381_v38 = vld [vmem:[%s1793_s4 + $0x58] sm:$0xff]  ;;  %v380_v39 = vld [vmem:[%s1793_s4 + $0x50] sm:$0xff] }
  0x19   :  { %1089 = vmatprep.mubr.msk.f32.mxu0 %vm140_vm1, %v40_v24  ;;  %v379_v40 = vld [vmem:[%s1793_s4 + $0x48] sm:$0xff]  ;;  %v378_v41 = vld [vmem:[%s1793_s4 + $0x40] sm:$0xff]  ;;  %v377_v42 = vld [vmem:[%s1793_s4 + $0x38] sm:$0xff]  ;;  %p1320_p4 = pnand %p1319_p3, %p1313_p0 }
  0x1a   :  { %87 = vperm.xlu0 %1246, %v49_v25   ;;  %82 = vperm.xlu1 %1247, %v48_v27   ;;  %v376_v43 = vld [vmem:[%s1793_s4 + $0x30] sm:$0xff]  ;;  %v375_v44 = vld [vmem:[%s1793_s4 + $0x28] sm:$0xff]  ;;  %v374_v45 = vld [vmem:[%s1793_s4 + $0x20] sm:$0xff] }
  0x1b   :  { %v373_v46 = vld [vmem:[%s1793_s4 + $0x18] sm:$0xff]  ;;  %v372_v47 = vld [vmem:[%s1793_s4 + $0x10] sm:$0xff]  ;;  %v371_v48 = vld [vmem:[%s1793_s4 + $0x8] sm:$0xff] }
  0x1c   :  { %1090 = vmatmul.mubr.msk.f32.gmra.mxu0 %vm140_vm1, %v41_v26  ;;  %v370_v49 = vld [vmem:[%s1793_s4] sm:$0xff] }
  0x1d   :  { %1092 = vmatprep.mubr.msk.f32.mxu0 %vm140_vm1, %v42_v28  ;;  %v354_v50 = vld [vmem:[%s1792_s3] sm:$0xff] }
  0x1e   :  { %77 = vperm.xlu0 %1246, %v47_v29   ;;  %72 = vperm.xlu1 %1247, %v46_v31  }
  0x1f   :  { %1127 = vmatprep.mubr.f32.mxu1 %v354_v50 }
  0x20   :  { %1093 = vmatmul.mubr.msk.f32.gmra.mxu0 %vm140_vm1, %v43_v30 }
  0x22   :  { %67 = vperm.xlu0 %1246, %v45_v32   ;;  %62 = vperm.xlu1 %1247, %v44_v33  }
  0x26   :  { %463 = vperm.xlu0 %1246, %v385_v34   ;;  %458 = vperm.xlu1 %1247, %v384_v35  }
  0x2a   :  { %453 = vperm.xlu0 %1246, %v383_v36   ;;  %448 = vperm.xlu1 %1247, %v382_v37  }
  0x2e   :  { %443 = vperm.xlu0 %1246, %v381_v38   ;;  %438 = vperm.xlu1 %1247, %v380_v39  }
  0x32   :  { %433 = vperm.xlu0 %1246, %v379_v40   ;;  %428 = vperm.xlu1 %1247, %v378_v41  }
  0x36   :  { %423 = vperm.xlu0 %1246, %v377_v42   ;;  %418 = vperm.xlu1 %1247, %v376_v43  }
  0x3a   :  { %413 = vperm.xlu0 %1246, %v375_v44   ;;  %408 = vperm.xlu1 %1247, %v374_v45  }
  0x3e   :  { %403 = vperm.xlu0 %1246, %v373_v46   ;;  %398 = vperm.xlu1 %1247, %v372_v47  }
  0x42   :  { %393 = vperm.xlu0 %1246, %v371_v48   ;;  %388 = vperm.xlu1 %1247, %v370_v49  }
  0x7f   :  { %v138_v57 = vpop.permute.xlu0 %137 }
  0x80   :  { %v128_v59 = vpop.permute.xlu1 %127 }
  0x83   :  { %v133_v62 = vpop.permute.xlu0 %132 }
  0x84   :  { %v123_v0 = vpop.permute.xlu1 %122 }
  0x87   :  { %v118_v3 = vpop.permute.xlu0 %117 }
  0x88   :  { %v113_v5 = vpop.permute.xlu1 %112 }
  0x8d   :  { %v108_v9 = vpop.permute.xlu0 %107  ;;  %v103_v13 = vpop.permute.xlu1 %102 }
  0x91   :  { %v98_v16 = vpop.permute.xlu0 %97  ;;  %v93_v18 = vpop.permute.xlu1 %92 }
  0x95   :  { %v88_v21 = vpop.permute.xlu0 %87  ;;  %v83_v24 = vpop.permute.xlu1 %82 }
  0x99   :  { %v78_v29 = vpop.permute.xlu0 %77  ;;  %v73_v32 = vpop.permute.xlu1 %72 }
  0x9d   :  { %v68_v37 = vpop.permute.xlu0 %67  ;;  %v63_v40 = vpop.permute.xlu1 %62 }
  0xc4   :  { %v1544_v51 = vpop.f32.mrf.mxu0 }
  0xc5   :  { %v265_v38 = vadd.f32 %v1544_v51, %v68_v37  ;;  %v355_v51 = vld [vmem:[%s1792_s3 + $0x8] sm:$0xff] }
  0xc6   :  { %v1546_v52 = vpop.f32.mrf.mxu0 }
  0xc7   :  { %v260_v41 = vadd.f32 %v1546_v52, %v63_v40  ;;  %v356_v52 = vld [vmem:[%s1792_s3 + $0x10] sm:$0xff] }
  0xc8   :  { %v1076_v53 = vpop.f32.mrf.mxu0 }
  0xc9   :  { %v275_v33 = vadd.f32 %v1076_v53, %v78_v29  ;;  %v357_v53 = vld [vmem:[%s1792_s3 + $0x18] sm:$0xff] }
  0xca   :  { %v1548_v54 = vpop.f32.mrf.mxu0 }
  0xcb   :  { %v270_v35 = vadd.f32 %v1548_v54, %v73_v32  ;;  %v358_v54 = vld [vmem:[%s1792_s3 + $0x20] sm:$0xff] }
  0xcc   :  { %v1079_v55 = vpop.f32.mrf.mxu0 }
  0xcd   :  { %v285_v27 = vadd.f32 %v1079_v55, %v88_v21  ;;  %v359_v55 = vld [vmem:[%s1792_s3 + $0x28] sm:$0xff] }
  0xce   :  { %v279_v56 = vpop.f32.mrf.mxu0 }
  0xcf   :  { %v280_v30 = vadd.f32 %v279_v56, %v83_v24  ;;  %v360_v56 = vld [vmem:[%s1792_s3 + $0x30] sm:$0xff] }
  0xd0   :  { %v1082_v58 = vpop.f32.mrf.mxu0 }
  0xd1   :  { %v295_v22 = vadd.f32 %v1082_v58, %v98_v16  ;;  %v362_v58 = vld [vmem:[%s1792_s3 + $0x40] sm:$0xff] }
  0xd2   :  { %v289_v60 = vpop.f32.mrf.mxu0 }
  0xd3   :  { %v290_v25 = vadd.f32 %v289_v60, %v93_v18  ;;  %v364_v60 = vld [vmem:[%s1792_s3 + $0x50] sm:$0xff] }
  0xd4   :  { %v1085_v61 = vpop.f32.mrf.mxu0 }
  0xd5   :  { %v305_v19 = vadd.f32 %v1085_v61, %v108_v9  ;;  %v365_v61 = vld [vmem:[%s1792_s3 + $0x58] sm:$0xff]  ;;  %v459_v9 = vpop.permute.xlu1 %458 }
  0xd6   :  { %v299_v63 = vpop.f32.mrf.mxu0 }
  0xd7   :  { %v300_v20 = vadd.f32 %v299_v63, %v103_v13  ;;  %v367_v63 = vld [vmem:[%s1792_s3 + $0x68] sm:$0xff] }
  0xd8   :  { %v1088_v1 = vpop.f32.mrf.mxu0 }
  0xd9   :  { %v315_v15 = vadd.f32 %v1088_v1, %v118_v3  ;;  %v369_v1 = vld [vmem:[%s1792_s3 + $0x78] sm:$0xff] }
  0xda   :  { %v309_v2 = vpop.f32.mrf.mxu0 }
  0xdb   :  { %v310_v17 = vadd.f32 %v309_v2, %v113_v5  ;;  %v691_v2 = vld [vmem:[%s1794_s5] sm:$0xff] }
  0xdc   :  { %v1091_v4 = vpop.f32.mrf.mxu0  ;;  %1183 = vmatprep.mubr.f32.mxu0 %v691_v2 }
  0xdd   :  { %v325_v11 = vadd.f32 %v1091_v4, %v128_v59  ;;  %v363_v59 = vld [vmem:[%s1792_s3 + $0x48] sm:$0xff] }
  0xde   :  { %v319_v6 = vpop.f32.mrf.mxu0 }
  0xdf   :  { %v320_v14 = vadd.f32 %v319_v6, %v123_v0  ;;  %v368_v0 = vld [vmem:[%s1792_s3 + $0x70] sm:$0xff] }
  0xe0   :  { %v1094_v7 = vpop.f32.mrf.mxu0 }
  0xe1   :  { %v335_v8 = vadd.f32 %v1094_v7, %v138_v57  ;;  %v361_v57 = vld [vmem:[%s1792_s3 + $0x38] sm:$0xff]  ;;  %v464_v7 = vpop.permute.xlu0 %463 }
  0xe2   :  { %v329_v10 = vpop.f32.mrf.mxu0 }
  0xe3   :  { %1248 = vtanh.f32 %v335_v8  ;;  %v330_v12 = vadd.f32 %v329_v10, %v133_v62  ;;  %v366_v62 = vld [vmem:[%s1792_s3 + $0x60] sm:$0xff] }
  0xe5   :  { %1250 = vtanh.f32 %v330_v12  ;;  %v454_v12 = vpop.permute.xlu0 %453 }
  0xe6   :  { %1252 = vtanh.f32 %v325_v11 }
  0xe7   :  { %1254 = vtanh.f32 %v320_v14  ;;  %v449_v14 = vpop.permute.xlu1 %448 }
  0xe8   :  { %1256 = vtanh.f32 %v315_v15 }
  0xe9   :  { %1258 = vtanh.f32 %v310_v17  ;;  %v444_v17 = vpop.permute.xlu0 %443 }
  0xea   :  { %1260 = vtanh.f32 %v305_v19 }
  0xeb   :  { %1262 = vtanh.f32 %v300_v20  ;;  %v439_v19 = vpop.permute.xlu1 %438 }
  0xec   :  { %1264 = vtanh.f32 %v295_v22 }
  0xed   :  { %1266 = vtanh.f32 %v290_v25  ;;  %v434_v22 = vpop.permute.xlu0 %433 }
  0xee   :  { %1268 = vtanh.f32 %v285_v27 }
  0xef   :  { %1270 = vtanh.f32 %v280_v30  ;;  %v429_v27 = vpop.permute.xlu1 %428 }
  0xf0   :  { %v1550_v23 = vpop.eup %1248  ;;  %1272 = vtanh.f32 %v275_v33 }
  0xf1   :  { %1095 = vmatprep.subr.mxu1 %v1550_v23  ;;  %1274 = vtanh.f32 %v270_v35 }
  0xf2   :  { %v1553_v26 = vpop.eup %1250  ;;  %1096 = vmatpush3.msra.mxu1 %v1550_v23  ;;  %1276 = vtanh.f32 %v265_v38  ;;  %v424_v38 = vpop.permute.xlu0 %423 }
  0xf3   :  { %1097 = vmatprep.subr.mxu1 %v1553_v26  ;;  %v1557_v28 = vpop.eup %1252  ;;  %1278 = vtanh.f32 %v260_v41  ;;  %v419_v41 = vpop.permute.xlu1 %418 }
  0xf4   :  { %1098 = vmatpush3.msra.mxu1 %v1553_v26  ;;  %v1561_v31 = vpop.eup %1254 }
  0xf5   :  { %1099 = vmatprep.subr.mxu1 %v1557_v28  ;;  %v1565_v34 = vpop.eup %1256 }
  0xf6   :  { %1100 = vmatpush3.msra.mxu1 %v1557_v28  ;;  %v1570_v36 = vpop.eup %1258 }
  0xf7   :  { %1101 = vmatprep.subr.mxu1 %v1561_v31  ;;  %v1575_v39 = vpop.eup %1260 }
  0xf8   :  { %1102 = vmatpush3.msra.mxu1 %v1561_v31  ;;  %v1580_v42 = vpop.eup %1262 }
  0xf9   :  { %1103 = vmatprep.subr.mxu1 %v1565_v34  ;;  %v1584_v43 = vpop.eup %1264 }
  0xfa   :  { %1104 = vmatpush3.msra.mxu1 %v1565_v34  ;;  %v1588_v44 = vpop.eup %1266 }
  0xfb   :  { %1105 = vmatprep.subr.mxu1 %v1570_v36  ;;  %v1592_v45 = vpop.eup %1268 }
  0xfc   :  { %1106 = vmatpush3.msra.mxu1 %v1570_v36  ;;  %v1596_v46 = vpop.eup %1270 }
  0xfd   :  { %1107 = vmatprep.subr.mxu1 %v1575_v39  ;;  %v1600_v47 = vpop.eup %1272 }
  0xfe   :  { %1108 = vmatpush3.msra.mxu1 %v1575_v39  ;;  %v1604_v48 = vpop.eup %1274 }
  0xff   :  { %1109 = vmatprep.subr.mxu1 %v1580_v42  ;;  %v1608_v49 = vpop.eup %1276 }
 0x100   :  { %1110 = vmatpush3.msra.mxu1 %v1580_v42  ;;  %v1612_v50 = vpop.eup %1278 }
 0x101   :  { %1111 = vmatprep.subr.mxu1 %v1584_v43 }
 0x102   :  { %1112 = vmatpush3.msra.mxu1 %v1584_v43 }
 0x103   :  { %1113 = vmatprep.subr.mxu1 %v1588_v44 }
 0x104   :  { %1114 = vmatpush3.msra.mxu1 %v1588_v44 }
 0x105   :  { %1115 = vmatprep.subr.mxu1 %v1592_v45 }
 0x106   :  { %1116 = vmatpush3.msra.mxu1 %v1592_v45 }
 0x107   :  { %1117 = vmatprep.subr.mxu1 %v1596_v46 }
 0x108   :  { %1118 = vmatpush3.msra.mxu1 %v1596_v46 }
 0x109   :  { %1119 = vmatprep.subr.mxu1 %v1600_v47 }
 0x10a   :  { %1120 = vmatpush3.msra.mxu1 %v1600_v47 }
 0x10b   :  { %1121 = vmatprep.subr.mxu1 %v1604_v48 }
 0x10c   :  { %1122 = vmatpush3.msra.mxu1 %v1604_v48 }
 0x10d   :  { %1123 = vmatprep.subr.mxu1 %v1608_v49 }
 0x10e   :  { %1124 = vmatpush3.msra.mxu1 %v1608_v49 }
 0x10f   :  { %1125 = vmatprep.subr.mxu1 %v1612_v50 }
 0x110   :  { %1126 = vmatpush3.msra.mxu1 %v1612_v50 }
 0x111   :  { %1128 = vmatmul.mubr.f32.vlgmr.msra.gmra.mxu1 %v355_v51 }
 0x112   :  { %1130 = vmatprep.mubr.f32.mxu1 %v356_v52 }
 0x115   :  { %1131 = vmatmul.mubr.f32.gmra.mxu1 %v357_v53  ;;  %v414_v53 = vpop.permute.xlu0 %413 }
 0x116   :  { %1133 = vmatprep.mubr.f32.mxu1 %v358_v54 }
 0x119   :  { %1134 = vmatmul.mubr.f32.gmra.mxu1 %v359_v55  ;;  %v409_v55 = vpop.permute.xlu1 %408 }
 0x11a   :  { %1136 = vmatprep.mubr.f32.mxu1 %v360_v56 }
 0x11d   :  { %1137 = vmatmul.mubr.f32.gmra.mxu1 %v361_v57 }
 0x11e   :  { %1139 = vmatprep.mubr.f32.mxu1 %v362_v58 }
 0x121   :  { %1140 = vmatmul.mubr.f32.gmra.mxu1 %v363_v59 }
 0x122   :  { %1142 = vmatprep.mubr.f32.mxu1 %v364_v60  ;;  %v404_v60 = vpop.permute.xlu0 %403 }
 0x125   :  { %1143 = vmatmul.mubr.f32.gmra.mxu1 %v365_v61 }
 0x126   :  { %1145 = vmatprep.mubr.f32.mxu1 %v366_v62 }
 0x129   :  { %1146 = vmatmul.mubr.f32.gmra.mxu1 %v367_v63 }
 0x12a   :  { %1148 = vmatprep.mubr.f32.mxu1 %v368_v0 }
 0x12d   :  { %1149 = vmatmul.mubr.f32.gmra.mxu1 %v369_v1  ;;  %v399_v1 = vpop.permute.xlu1 %398 }
 0x1d1   :  { %v1665_v3 = vpop.f32.mrf.mxu1 }
 0x1d3   :  { %v1667_v4 = vpop.f32.mrf.mxu1 }
 0x1d5   :  { %v1132_v5 = vpop.f32.mrf.mxu1 }
 0x1d6   :  { %v548_v2 = vadd.f32 %v1132_v5, %v404_v60 }
 0x1d7   :  { %v542_v6 = vpop.f32.mrf.mxu1 }
 0x1d9   :  { %v1135_v8 = vpop.f32.mrf.mxu1 }
 0x1da   :  { %v558_v58 = vadd.f32 %v1135_v8, %v414_v53 }
 0x1db   :  { %v552_v10 = vpop.f32.mrf.mxu1 }
 0x1dc   :  { %v553_v62 = vadd.f32 %v552_v10, %v409_v55 }
 0x1dd   :  { %v1138_v11 = vpop.f32.mrf.mxu1 }
 0x1de   :  { %v568_v54 = vadd.f32 %v1138_v11, %v424_v38 }
 0x1df   :  { %v562_v13 = vpop.f32.mrf.mxu1 }
 0x1e0   :  { %v563_v56 = vadd.f32 %v562_v13, %v419_v41 }
 0x1e1   :  { %v1141_v15 = vpop.f32.mrf.mxu1 }
 0x1e2   :  { %v578_v51 = vadd.f32 %v1141_v15, %v434_v22 }
 0x1e3   :  { %v572_v16 = vpop.f32.mrf.mxu1 }
 0x1e4   :  { %v573_v52 = vadd.f32 %v572_v16, %v429_v27  ;;  %v394_v16 = vpop.permute.xlu0 %393 }
 0x1e5   :  { %v1144_v18 = vpop.f32.mrf.mxu1  ;;  %v538_v10 = vadd.f32 %v1665_v3, %v394_v16  ;;  %v700_v16 = vld [vmem:[%s1794_s5 + $0x48] sm:$0xff] }
 0x1e6   :  { %v588_v35 = vadd.f32 %v1144_v18, %v444_v17 }
 0x1e7   :  { %v582_v20 = vpop.f32.mrf.mxu1 }
 0x1e8   :  { %v583_v40 = vadd.f32 %v582_v20, %v439_v19  ;;  %v389_v19 = vpop.permute.xlu1 %388 }
 0x1e9   :  { %v1147_v21 = vpop.f32.mrf.mxu1  ;;  %v533_v20 = vadd.f32 %v1667_v4, %v389_v19  ;;  %v705_v19 = vld [vmem:[%s1794_s5 + $0x70] sm:$0xff] }
 0x1ea   :  { %v598_v24 = vadd.f32 %v1147_v21, %v454_v12 }
 0x1eb   :  { %v592_v25 = vpop.f32.mrf.mxu1 }
 0x1ec   :  { %v593_v29 = vadd.f32 %v592_v25, %v449_v14  ;;  %1280 = vtanh.f32 %v598_v24  ;;  %v543_v14 = vadd.f32 %v542_v6, %v399_v1 }
 0x1ed   :  { %v1150_v30 = vpop.f32.mrf.mxu1 }
 0x1ee   :  { %v608_v32 = vadd.f32 %v1150_v30, %v464_v7 }
 0x1ef   :  { %v602_v33 = vpop.f32.mrf.mxu1 }
 0x1f0   :  { %1282 = vtanh.f32 %v608_v32  ;;  %v603_v37 = vadd.f32 %v602_v33, %v459_v9 }
 0x1f1   :  { %1284 = vtanh.f32 %v593_v29 }
 0x1f2   :  { %1286 = vtanh.f32 %v603_v37 }
 0x1f3   :  { %1288 = vtanh.f32 %v588_v35 }
 0x1f4   :  { %1290 = vtanh.f32 %v583_v40 }
 0x1f5   :  { %1292 = vtanh.f32 %v578_v51 }
 0x1f6   :  { %1294 = vtanh.f32 %v573_v52 }
 0x1f7   :  { %1296 = vtanh.f32 %v568_v54 }
 0x1f8   :  { %1298 = vtanh.f32 %v563_v56 }
 0x1f9   :  { %v1281_v57 = vpop.eup %1280  ;;  %1300 = vtanh.f32 %v558_v58 }
 0x1fa   :  { %v640_v11 = vmul.f32 %v1281_v57, %v1281_v57  ;;  %1302 = vtanh.f32 %v553_v62 }
 0x1fb   :  { %1304 = vtanh.f32 %v548_v2 }
 0x1fc   :  { %v656_v17 = vsub.f32 1.0, %v640_v11  ;;  %1306 = vtanh.f32 %v543_v14  ;;  %v694_v11 = vld [vmem:[%s1794_s5 + $0x18] sm:$0xff]  ;;  %v696_v14 = vld [vmem:[%s1794_s5 + $0x28] sm:$0xff] }
 0x1fd   :  { %v1283_v59 = vpop.eup %1282  ;;  %1308 = vtanh.f32 %v538_v10  ;;  %v701_v10 = vld [vmem:[%s1794_s5 + $0x50] sm:$0xff] }
 0x1fe   :  { %v1285_v61 = vpop.eup %1284  ;;  %v642_v63 = vmul.f32 %v1283_v59, %v1283_v59  ;;  %1310 = vtanh.f32 %v533_v20  ;;  %v706_v20 = vld [vmem:[%s1794_s5 + $0x78] sm:$0xff] }
 0x1ff   :  { %v1287_v0 = vpop.eup %1286  ;;  %v639_v8 = vmul.f32 %v1285_v61, %v1285_v61 }
 0x200   :  { %v658_v7 = vsub.f32 1.0, %v642_v63  ;;  %v641_v9 = vmul.f32 %v1287_v0, %v1287_v0  ;;  %v1289_v12 = vpop.eup %1288 }
 0x201   :  { %v1291_v15 = vpop.eup %1290  ;;  %v638_v18 = vmul.f32 %v1289_v12, %v1289_v12  ;;  %v655_v6 = vsub.f32 1.0, %v639_v8  ;;  %v695_v12 = vld [vmem:[%s1794_s5 + $0x20] sm:$0xff]  ;;  %v698_v8 = vld [vmem:[%s1794_s5 + $0x38] sm:$0xff] }
 0x202   :  { %1151 = vmatprep.subr.mxu0 %v658_v7  ;;  %v657_v13 = vsub.f32 1.0, %v641_v9  ;;  %v1293_v5 = vpop.eup %1292  ;;  %v637_v21 = vmul.f32 %v1291_v15, %v1291_v15  ;;  %v693_v9 = vld [vmem:[%s1794_s5 + $0x10] sm:$0xff]  ;;  %v699_v15 = vld [vmem:[%s1794_s5 + $0x40] sm:$0xff] }
 0x203   :  { %1152 = vmatpush3.msra.mxu0 %v658_v7  ;;  %v1295_v22 = vpop.eup %1294  ;;  %v654_v24 = vsub.f32 1.0, %v638_v18  ;;  %v636_v25 = vmul.f32 %v1293_v5, %v1293_v5  ;;  %v692_v7 = vld [vmem:[%s1794_s5 + $0x8] sm:$0xff]  ;;  %v703_v18 = vld [vmem:[%s1794_s5 + $0x60] sm:$0xff] }
 0x204   :  { %1153 = vmatprep.subr.mxu0 %v657_v13  ;;  %v1297_v3 = vpop.eup %1296  ;;  %v653_v27 = vsub.f32 1.0, %v637_v21  ;;  %v635_v29 = vmul.f32 %v1295_v22, %v1295_v22  ;;  %v704_v5 = vld [vmem:[%s1794_s5 + $0x68] sm:$0xff] }
 0x205   :  { %1154 = vmatpush3.msra.mxu0 %v657_v13  ;;  %v1299_v30 = vpop.eup %1298  ;;  %v652_v4 = vsub.f32 1.0, %v636_v25  ;;  %v634_v32 = vmul.f32 %v1297_v3, %v1297_v3  ;;  %v697_v13 = vld [vmem:[%s1794_s5 + $0x30] sm:$0xff] }
 0x206   :  { %1155 = vmatprep.subr.mxu0 %v656_v17  ;;  %v1301_v33 = vpop.eup %1300  ;;  %v651_v35 = vsub.f32 1.0, %v635_v29  ;;  %v633_v37 = vmul.f32 %v1299_v30, %v1299_v30 }
 0x207   :  { %1156 = vmatpush3.msra.mxu0 %v656_v17  ;;  %v1303_v38 = vpop.eup %1302  ;;  %v650_v40 = vsub.f32 1.0, %v634_v32  ;;  %v632_v41 = vmul.f32 %v1301_v33, %v1301_v33  ;;  %v702_v17 = vld [vmem:[%s1794_s5 + $0x58] sm:$0xff] }
 0x208   :  { %1157 = vmatprep.subr.mxu0 %v655_v6  ;;  %v1305_v51 = vpop.eup %1304  ;;  %v649_v52 = vsub.f32 1.0, %v633_v37  ;;  %v631_v53 = vmul.f32 %v1303_v38, %v1303_v38  ;;  %v674_v37 = vmul.f32 %v1550_v23, %v1550_v23 }
 0x209   :  { %1158 = vmatpush3.msra.mxu0 %v655_v6  ;;  %v1307_v54 = vpop.eup %1306  ;;  %v648_v55 = vsub.f32 1.0, %v632_v41  ;;  %v630_v56 = vmul.f32 %v1305_v51, %v1305_v51  ;;  %v1335_v6 = vmov 0.0   ;;  %v672_v51 = vmul.f32 %v1557_v28, %v1557_v28 }
 0x20a   :  { %1159 = vmatprep.subr.mxu0 %v654_v24  ;;  %v1309_v57 = vpop.eup %1308  ;;  %v647_v58 = vsub.f32 1.0, %v631_v53  ;;  %v629_v59 = vmul.f32 %v1307_v54, %v1307_v54  ;;  %1207 = vmatprep.subr.mxu1 %v1335_v6  ;;  %v671_v54 = vmul.f32 %v1561_v31, %v1561_v31  ;;  %v668_v31 = vmul.f32 %v1575_v39, %v1575_v39 }
 0x20b   :  { %1160 = vmatpush3.msra.mxu0 %v654_v24  ;;  %v1311_v60 = vpop.eup %1310  ;;  %v646_v61 = vsub.f32 1.0, %v630_v56  ;;  %v628_v62 = vmul.f32 %v1309_v57, %v1309_v57  ;;  %1239 = vmatprep.mubr.msk.f32.mxu1 %vm1336_vm2, %v1335_v6  ;;  %v688_v23 = vsub.f32 1.0, %v672_v51  ;;  %v665_v39 = vmul.f32 %v1588_v44, %v1588_v44 }
 0x20c   :  { %1161 = vmatprep.subr.mxu0 %v653_v27  ;;  %v645_v63 = vsub.f32 1.0, %v629_v59  ;;  %v627_v0 = vmul.f32 %v1311_v60, %v1311_v60  ;;  %v687_v60 = vsub.f32 1.0, %v671_v54  ;;  %v662_v44 = vmul.f32 %v1600_v47, %v1600_v47 }
 0x20d   :  { %1162 = vmatpush3.msra.mxu0 %v653_v27  ;;  %v644_v1 = vsub.f32 1.0, %v628_v62 }
 0x20e   :  { %1163 = vmatprep.subr.mxu0 %v652_v4  ;;  %v643_v2 = vsub.f32 1.0, %v627_v0 }
 0x20f   :  { %1164 = vmatpush3.msra.mxu0 %v652_v4 }
 0x210   :  { %1165 = vmatprep.subr.mxu0 %v651_v35 }
 0x211   :  { %1166 = vmatpush3.msra.mxu0 %v651_v35 }
 0x212   :  { %1167 = vmatprep.subr.mxu0 %v650_v40 }
 0x213   :  { %1168 = vmatpush3.msra.mxu0 %v650_v40  ;;  %v673_v40 = vmul.f32 %v1553_v26, %v1553_v26  ;;  %v669_v26 = vmul.f32 %v1570_v36, %v1570_v36  ;;  %v666_v36 = vmul.f32 %v1584_v43, %v1584_v43  ;;  %v663_v43 = vmul.f32 %v1596_v46, %v1596_v46 }
 0x214   :  { %1169 = vmatprep.subr.mxu0 %v649_v52  ;;  %v660_v46 = vmul.f32 %v1608_v49, %v1608_v49 }
 0x215   :  { %1170 = vmatpush3.msra.mxu0 %v649_v52  ;;  %v690_v52 = vsub.f32 1.0, %v674_v37  ;;  %v689_v56 = vsub.f32 1.0, %v673_v40  ;;  %v685_v0 = vsub.f32 1.0, %v669_v26 }
 0x216   :  { %1171 = vmatprep.subr.mxu0 %v648_v55 }
 0x217   :  { %1172 = vmatpush3.msra.mxu0 %v648_v55 }
 0x218   :  { %1173 = vmatprep.subr.mxu0 %v647_v58 }
 0x219   :  { %1174 = vmatpush3.msra.mxu0 %v647_v58  ;;  %v670_v58 = vmul.f32 %v1565_v34, %v1565_v34  ;;  %v667_v34 = vmul.f32 %v1580_v42, %v1580_v42  ;;  %v664_v42 = vmul.f32 %v1592_v45, %v1592_v45  ;;  %v661_v45 = vmul.f32 %v1604_v48, %v1604_v48 }
 0x21a   :  { %1175 = vmatprep.subr.mxu0 %v646_v61 }
 0x21b   :  { %1176 = vmatpush3.msra.mxu0 %v646_v61  ;;  %v686_v61 = vsub.f32 1.0, %v670_v58 }
 0x21c   :  { %1177 = vmatprep.subr.mxu0 %v645_v63 }
 0x21d   :  { %1178 = vmatpush3.msra.mxu0 %v645_v63 }
 0x21e   :  { %1179 = vmatprep.subr.mxu0 %v644_v1 }
 0x21f   :  { %1180 = vmatpush3.msra.mxu0 %v644_v1  ;;  %v684_v1 = vsub.f32 1.0, %v668_v31 }
 0x220   :  { %1181 = vmatprep.subr.mxu0 %v643_v2 }
 0x221   :  { %1182 = vmatpush3.msra.mxu0 %v643_v2 }
 0x222   :  { %1184 = vmatmul.mubr.f32.vlgmr.msra.gmra.mxu0 %v692_v7 }
 0x223   :  { %1186 = vmatprep.mubr.f32.mxu0 %v693_v9  ;;  %v683_v9 = vsub.f32 1.0, %v667_v34 }
 0x226   :  { %1187 = vmatmul.mubr.f32.gmra.mxu0 %v694_v11  ;;  %v682_v11 = vsub.f32 1.0, %v666_v36 }
 0x227   :  { %1189 = vmatprep.mubr.f32.mxu0 %v695_v12 }
 0x22a   :  { %1190 = vmatmul.mubr.f32.gmra.mxu0 %v696_v14 }
 0x22b   :  { %1192 = vmatprep.mubr.f32.mxu0 %v697_v13  ;;  %v681_v13 = vsub.f32 1.0, %v665_v39 }
 0x22e   :  { %1193 = vmatmul.mubr.f32.gmra.mxu0 %v698_v8  ;;  %v680_v8 = vsub.f32 1.0, %v664_v42 }
 0x22f   :  { %1195 = vmatprep.mubr.f32.mxu0 %v699_v15 }
 0x232   :  { %1196 = vmatmul.mubr.f32.gmra.mxu0 %v700_v16 }
 0x233   :  { %1198 = vmatprep.mubr.f32.mxu0 %v701_v10  ;;  %v679_v10 = vsub.f32 1.0, %v663_v43 }
 0x236   :  { %1199 = vmatmul.mubr.f32.gmra.mxu0 %v702_v17  ;;  %v678_v17 = vsub.f32 1.0, %v662_v44 }
 0x237   :  { %1201 = vmatprep.mubr.f32.mxu0 %v703_v18  ;;  %v659_v18 = vmul.f32 %v1612_v50, %v1612_v50 }
 0x23a   :  { %1202 = vmatmul.mubr.f32.gmra.mxu0 %v704_v5  ;;  %v677_v5 = vsub.f32 1.0, %v661_v45 }
 0x23b   :  { %1204 = vmatprep.mubr.f32.mxu0 %v705_v19  ;;  %v676_v19 = vsub.f32 1.0, %v660_v46 }
 0x23e   :  { %1205 = vmatmul.mubr.f32.gmra.mxu0 %v706_v20 }
 0x2e2   :  { %v1718_v21 = vpop.f32.mrf.mxu0 }
 0x2e3   :  { %v853_v49 = vmul.f32 %v1718_v21, %v676_v19 }
 0x2e4   :  { %v1720_v22 = vpop.f32.mrf.mxu0 }
 0x2e6   :  { %v1722_v24 = vpop.f32.mrf.mxu0 }
 0x2e7   :  { %v855_v48 = vmul.f32 %v1722_v24, %v678_v17  ;;  %v868_v24 = vld [vmem:[%s1795_s6] sm:$0xf] }
 0x2e8   :  { %v1724_v25 = vpop.f32.mrf.mxu0 }
 0x2e9   :  { %v854_v20 = vmul.f32 %v1724_v25, %v677_v5 }
 0x2ea   :  { %v1726_v3 = vpop.f32.mrf.mxu0 }
 0x2eb   :  { %v857_v16 = vmul.f32 %v1726_v3, %v680_v8  ;;  %v675_v3 = vsub.f32 1.0, %v659_v18 }
 0x2ec   :  { %v1728_v27 = vpop.f32.mrf.mxu0 }
 0x2ed   :  { %v856_v47 = vmul.f32 %v1728_v27, %v679_v10  ;;  %v852_v50 = vmul.f32 %v1720_v22, %v675_v3 }
 0x2ee   :  { %v1194_v29 = vpop.f32.mrf.mxu0 }
 0x2ef   :  { %v859_v14 = vmul.f32 %v1194_v29, %v682_v11 }
 0x2f0   :  { %v803_v30 = vpop.f32.mrf.mxu0 }
 0x2f1   :  { %v858_v15 = vmul.f32 %v803_v30, %v681_v13 }
 0x2f2   :  { %v1197_v4 = vpop.f32.mrf.mxu0 }
 0x2f3   :  { %v861_v7 = vmul.f32 %v1197_v4, %v684_v1 }
 0x2f4   :  { %v813_v32 = vpop.f32.mrf.mxu0 }
 0x2f5   :  { %v860_v12 = vmul.f32 %v813_v32, %v683_v9 }
 0x2f6   :  { %v1200_v33 = vpop.f32.mrf.mxu0 }
 0x2f7   :  { %v863_v63 = vmul.f32 %v1200_v33, %v686_v61 }
 0x2f8   :  { %v823_v35 = vpop.f32.mrf.mxu0 }
 0x2f9   :  { %v862_v2 = vmul.f32 %v823_v35, %v685_v0 }
 0x2fa   :  { %v1203_v38 = vpop.f32.mrf.mxu0 }
 0x2fb   :  { %v865_v28 = vmul.f32 %v1203_v38, %v688_v23 }
 0x2fc   :  { %v833_v41 = vpop.f32.mrf.mxu0 }
 0x2fd   :  { %v864_v62 = vmul.f32 %v833_v41, %v687_v60 }
 0x2fe   :  { %v1206_v53 = vpop.f32.mrf.mxu0 }
 0x2ff   :  { %v867_v55 = vmul.f32 %v1206_v53, %v690_v52 }
 0x300   :  { %v843_v57 = vpop.f32.mrf.mxu0 }
 0x301   :  { %v866_v59 = vmul.f32 %v843_v57, %v689_v56  ;;  %1208 = vmatpush3.msra.mxu1 %v867_v55 }
 0x302   :  { %1209 = vmatprep.subr.mxu1 %v1335_v6 }
 0x303   :  { %1210 = vmatpush3.msra.mxu1 %v866_v59 }
 0x304   :  { %1211 = vmatprep.subr.mxu1 %v1335_v6 }
 0x305   :  { %1212 = vmatpush3.msra.mxu1 %v865_v28 }
 0x306   :  { %1213 = vmatprep.subr.mxu1 %v1335_v6 }
 0x307   :  { %1214 = vmatpush3.msra.mxu1 %v864_v62 }
 0x308   :  { %1215 = vmatprep.subr.mxu1 %v1335_v6 }
 0x309   :  { %1216 = vmatpush3.msra.mxu1 %v863_v63 }
 0x30a   :  { %1217 = vmatprep.subr.mxu1 %v1335_v6 }
 0x30b   :  { %1218 = vmatpush3.msra.mxu1 %v862_v2 }
 0x30c   :  { %1219 = vmatprep.subr.mxu1 %v1335_v6 }
 0x30d   :  { %1220 = vmatpush3.msra.mxu1 %v861_v7 }
 0x30e   :  { %1221 = vmatprep.subr.mxu1 %v1335_v6 }
 0x30f   :  { %1222 = vmatpush3.msra.mxu1 %v860_v12 }
 0x310   :  { %1223 = vmatprep.subr.mxu1 %v1335_v6 }
 0x311   :  { %1224 = vmatpush3.msra.mxu1 %v859_v14 }
 0x312   :  { %1225 = vmatprep.subr.mxu1 %v1335_v6 }
 0x313   :  { %1226 = vmatpush3.msra.mxu1 %v858_v15 }
 0x314   :  { %1227 = vmatprep.subr.mxu1 %v1335_v6 }
 0x315   :  { %1228 = vmatpush3.msra.mxu1 %v857_v16 }
 0x316   :  { %1229 = vmatprep.subr.mxu1 %v1335_v6 }
 0x317   :  { %1230 = vmatpush3.msra.mxu1 %v856_v47 }
 0x318   :  { %1231 = vmatprep.subr.mxu1 %v1335_v6 }
 0x319   :  { %1232 = vmatpush3.msra.mxu1 %v855_v48 }
 0x31a   :  { %1233 = vmatprep.subr.mxu1 %v1335_v6 }
 0x31b   :  { %1234 = vmatpush3.msra.mxu1 %v854_v20 }
 0x31c   :  { %1235 = vmatprep.subr.mxu1 %v1335_v6 }
 0x31d   :  { %1236 = vmatpush3.msra.mxu1 %v853_v49 }
 0x31e   :  { %1237 = vmatprep.subr.mxu1 %v1335_v6 }
 0x31f   :  { %1238 = vmatpush3.msra.mxu1 %v852_v50 }
 0x320   :  { %1240 = vmatmul.mubr.f32.vlgmr.msra.gmra.mxu1 %v868_v24 }
 0x3e0   :  { %v935_v25 = vpop.f32.mrf.mxu1 }
 0x3e1   :  { %939 = vst [vmem:[#allocation2] sm:$0xf] %v935_v25 }
 0x3e2   :  { %v1241_v21 = vpop.f32.mrf.mxu1 }
 0x3e3   :  { %1323 = shalt.err (!%p1320_p4)
}
 0x3e4   :  { %949 = dma.vmem_to_hbm [thread:$0]  %s947_s8, 64, %s1796_s7, [#allocation3]  }
 0x3e5   :  { %1332 = dma.done.wait [#allocation3], 64  }
 0x3e6   :  { %1333 = vsyncadd [#allocation3], 4294967232 }
 0x3e7   :  { %953 = vsyncpa [#allocation3], 1 }

// kernel: tpu_custom_call.1
= control target key start
LH: loop header
LB: loop body
LE: loop exit
PB: predicated region body
PF: predicated region fallthrough
CT: control target
= control target key end

     0   :  { %vm189_vm0 = vcmask 1043456   ;;  %vm140_vm1 = vcmask 31744   ;;  %v1334_v4 = vmov 0   ;;  %s1789_s0 = inlined_call_operand.vmem [shape: f32[4,128], index: 0, kind: input, shape index: {}]   ;;  %s1790_s1 = inlined_call_operand.vmem [shape: f32[128,4], index: 1, kind: input, shape index: {}]   ;;  %s1791_s2 = inlined_call_operand.vmem [shape: f32[128,1], index: 2, kind: input, shape index: {}]   ;;  %s1792_s3 = inlined_call_operand.vmem [shape: f32[128,128], index: 3, kind: input, shape index: {}]   ;;  %s1793_s4 = inlined_call_operand.vmem [shape: f32[128,1], index: 4, kind: input, shape index: {}]   ;;  %s1794_s5 = inlined_call_operand.vmem [shape: f32[128,128], index: 5, kind: input, shape index: {}]   ;;  %s1795_s6 = inlined_call_operand.vmem [shape: f32[4,128], index: 6, kind: input, shape index: {}]   ;;  %s1796_s7 = inlined_call_operand.hbm [shape: f32[4,128], index: 7, kind: output, shape index: {}]  }
   0x1   :  { %v27_v0 = vld [vmem:[%s1789_s0] sm:$0xf]  ;;  %v29_v2 = vld [vmem:[%s1790_s1 + $0x8] sm:$0xff]  ;;  %v30_v3 = vld [vmem:[%s1790_s1 + $0x10] sm:$0xff]  ;;  %1246 = vset.pattern.permute.xlu0 %v1334_v4  ;;  %1247 = vset.pattern.permute.xlu1 %v1334_v4 }
   0x2   :  { %v28_v1 = vld [vmem:[%s1790_s1] sm:$0xff]  ;;  %1069 = vmatprep.subr.msk.mxu0 %vm189_vm0, %v27_v0  ;;  %v31_v5 = vld [vmem:[%s1790_s1 + $0x18] sm:$0xff]  ;;  %v57_v8 = vld [vmem:[%s1791_s2 + $0x68] sm:$0xff] }
   0x3   :  { %1071 = vmatprep.mubr.msk.f32.mxu0 %vm140_vm1, %v28_v1  ;;  %1070 = vmatpush3.msk.msra.mxu0 %vm189_vm0, %v27_v0  ;;  %v32_v6 = vld [vmem:[%s1790_s1 + $0x20] sm:$0xff]  ;;  %v59_v7 = vld [vmem:[%s1791_s2 + $0x78] sm:$0xff]  ;;  %v58_v9 = vld [vmem:[%s1791_s2 + $0x70] sm:$0xff] }
   0x4   :  { %1072 = vmatmul.mubr.msk.f32.vlgmr.msra.gmra.mxu0 %vm140_vm1, %v29_v2  ;;  %137 = vperm.xlu0 %1246, %v59_v7   ;;  %v33_v10 = vld [vmem:[%s1790_s1 + $0x28] sm:$0xff]  ;;  %v56_v11 = vld [vmem:[%s1791_s2 + $0x60] sm:$0xff]  ;;  %v34_v12 = vld [vmem:[%s1790_s1 + $0x30] sm:$0xff] }
   0x5   :  { %1074 = vmatprep.mubr.msk.f32.mxu0 %vm140_vm1, %v30_v3  ;;  %127 = vperm.xlu1 %1247, %v57_v8   ;;  %v55_v13 = vld [vmem:[%s1791_s2 + $0x58] sm:$0xff]  ;;  %v54_v15 = vld [vmem:[%s1791_s2 + $0x50] sm:$0xff]  ;;  %v36_v16 = vld [vmem:[%s1790_s1 + $0x40] sm:$0xff] }
   0x6   :  { %v35_v14 = vld [vmem:[%s1790_s1 + $0x38] sm:$0xff]  ;;  %v53_v17 = vld [vmem:[%s1791_s2 + $0x48] sm:$0xff]  ;;  %v52_v19 = vld [vmem:[%s1791_s2 + $0x40] sm:$0xff] }
   0x7   :  { %v37_v18 = vld [vmem:[%s1790_s1 + $0x48] sm:$0xff] }
   0x8   :  { %1075 = vmatmul.mubr.msk.f32.gmra.mxu0 %vm140_vm1, %v31_v5  ;;  %132 = vperm.xlu0 %1246, %v58_v9  }
   0x9   :  { %1077 = vmatprep.mubr.msk.f32.mxu0 %vm140_vm1, %v32_v6  ;;  %122 = vperm.xlu1 %1247, %v56_v11  }
   0xc   :  { %1078 = vmatmul.mubr.msk.f32.gmra.mxu0 %vm140_vm1, %v33_v10  ;;  %117 = vperm.xlu0 %1246, %v55_v13  }
   0xd   :  { %1080 = vmatprep.mubr.msk.f32.mxu0 %vm140_vm1, %v34_v12  ;;  %112 = vperm.xlu1 %1247, %v54_v15  }
  0x10   :  { %1081 = vmatmul.mubr.msk.f32.gmra.mxu0 %vm140_vm1, %v35_v14 }
  0x11   :  { %1083 = vmatprep.mubr.msk.f32.mxu0 %vm140_vm1, %v36_v16 }
  0x12   :  { %12 = vsyncpa [#allocation3], 0  ;;  %v38_v20 = vld [vmem:[%s1790_s1 + $0x50] sm:$0xff]  ;;  %107 = vperm.xlu0 %1246, %v53_v17   ;;  %102 = vperm.xlu1 %1247, %v52_v19   ;;  %v51_v21 = vld [vmem:[%s1791_s2 + $0x38] sm:$0xff]  ;;  %vm1336_vm2 = vmmov 0   ;;  %s1337_s30 = smov [#allocation2]  }
  0x13   :  { %v39_v22 = vld [vmem:[%s1790_s1 + $0x58] sm:$0xff]  ;;  %v50_v23 = vld [vmem:[%s1791_s2 + $0x30] sm:$0xff]  ;;  %v40_v24 = vld [vmem:[%s1790_s1 + $0x60] sm:$0xff]  ;;  %s946_s8 = sshll.u32 %s1337_s30, 4  ;;  %s947_s8 = int_to_ptr.vmem [resolvable:$true] %s946_s8 }
  0x14   :  { %1084 = vmatmul.mubr.msk.f32.gmra.mxu0 %vm140_vm1, %v37_v18  ;;  %v49_v25 = vld [vmem:[%s1791_s2 + $0x28] sm:$0xff]  ;;  %v48_v27 = vld [vmem:[%s1791_s2 + $0x20] sm:$0xff]  ;;  %v42_v28 = vld [vmem:[%s1790_s1 + $0x70] sm:$0xff]  ;;  %s1312_s0 = scalar_lea.vmem %s947_s8, 64  ;;  %p1317_p1 = scmp.lt.s32.totalorder %s947_s8, %s947_s8 }
  0x15   :  { %1086 = vmatprep.mubr.msk.f32.mxu0 %vm140_vm1, %v38_v20  ;;  %v41_v26 = vld [vmem:[%s1790_s1 + $0x68] sm:$0xff]  ;;  %v47_v29 = vld [vmem:[%s1791_s2 + $0x18] sm:$0xff]  ;;  %v46_v31 = vld [vmem:[%s1791_s2 + $0x10] sm:$0xff]  ;;  %p1313_p0 = scmp.ne.s32.totalorder %s947_s8, %s1312_s0  ;;  %p1318_p2 = scmp.lt.s32.totalorder %s1312_s0, %s1312_s0 }
  0x16   :  { %97 = vperm.xlu0 %1246, %v51_v21   ;;  %92 = vperm.xlu1 %1247, %v50_v23   ;;  %v43_v30 = vld [vmem:[%s1790_s1 + $0x78] sm:$0xff]  ;;  %v45_v32 = vld [vmem:[%s1791_s2 + $0x8] sm:$0xff]  ;;  %v44_v33 = vld [vmem:[%s1791_s2] sm:$0xff] }
  0x17   :  { %v385_v34 = vld [vmem:[%s1793_s4 + $0x78] sm:$0xff]  ;;  %v384_v35 = vld [vmem:[%s1793_s4 + $0x70] sm:$0xff]  ;;  %v383_v36 = vld [vmem:[%s1793_s4 + $0x68] sm:$0xff]  ;;  %p1319_p3 = por %p1318_p2, %p1317_p1 }
  0x18   :  { %1087 = vmatmul.mubr.msk.f32.gmra.mxu0 %vm140_vm1, %v39_v22  ;;  %v382_v37 = vld [vmem:[%s1793_s4 + $0x60] sm:$0xff]  ;;  %v381_v38 = vld [vmem:[%s1793_s4 + $0x58] sm:$0xff]  ;;  %v380_v39 = vld [vmem:[%s1793_s4 + $0x50] sm:$0xff] }
  0x19   :  { %1089 = vmatprep.mubr.msk.f32.mxu0 %vm140_vm1, %v40_v24  ;;  %v379_v40 = vld [vmem:[%s1793_s4 + $0x48] sm:$0xff]  ;;  %v378_v41 = vld [vmem:[%s1793_s4 + $0x40] sm:$0xff]  ;;  %v377_v42 = vld [vmem:[%s1793_s4 + $0x38] sm:$0xff]  ;;  %p1320_p4 = pnand %p1319_p3, %p1313_p0 }
  0x1a   :  { %87 = vperm.xlu0 %1246, %v49_v25   ;;  %82 = vperm.xlu1 %1247, %v48_v27   ;;  %v376_v43 = vld [vmem:[%s1793_s4 + $0x30] sm:$0xff]  ;;  %v375_v44 = vld [vmem:[%s1793_s4 + $0x28] sm:$0xff]  ;;  %v374_v45 = vld [vmem:[%s1793_s4 + $0x20] sm:$0xff] }
  0x1b   :  { %v373_v46 = vld [vmem:[%s1793_s4 + $0x18] sm:$0xff]  ;;  %v372_v47 = vld [vmem:[%s1793_s4 + $0x10] sm:$0xff]  ;;  %v371_v48 = vld [vmem:[%s1793_s4 + $0x8] sm:$0xff] }
  0x1c   :  { %1090 = vmatmul.mubr.msk.f32.gmra.mxu0 %vm140_vm1, %v41_v26  ;;  %v370_v49 = vld [vmem:[%s1793_s4] sm:$0xff] }
  0x1d   :  { %1092 = vmatprep.mubr.msk.f32.mxu0 %vm140_vm1, %v42_v28  ;;  %v354_v50 = vld [vmem:[%s1792_s3] sm:$0xff] }
  0x1e   :  { %77 = vperm.xlu0 %1246, %v47_v29   ;;  %72 = vperm.xlu1 %1247, %v46_v31  }
  0x1f   :  { %1127 = vmatprep.mubr.f32.mxu1 %v354_v50 }
  0x20   :  { %1093 = vmatmul.mubr.msk.f32.gmra.mxu0 %vm140_vm1, %v43_v30 }
  0x22   :  { %67 = vperm.xlu0 %1246, %v45_v32   ;;  %62 = vperm.xlu1 %1247, %v44_v33  }
  0x26   :  { %463 = vperm.xlu0 %1246, %v385_v34   ;;  %458 = vperm.xlu1 %1247, %v384_v35  }
  0x2a   :  { %453 = vperm.xlu0 %1246, %v383_v36   ;;  %448 = vperm.xlu1 %1247, %v382_v37  }
  0x2e   :  { %443 = vperm.xlu0 %1246, %v381_v38   ;;  %438 = vperm.xlu1 %1247, %v380_v39  }
  0x32   :  { %433 = vperm.xlu0 %1246, %v379_v40   ;;  %428 = vperm.xlu1 %1247, %v378_v41  }
  0x36   :  { %423 = vperm.xlu0 %1246, %v377_v42   ;;  %418 = vperm.xlu1 %1247, %v376_v43  }
  0x3a   :  { %413 = vperm.xlu0 %1246, %v375_v44   ;;  %408 = vperm.xlu1 %1247, %v374_v45  }
  0x3e   :  { %403 = vperm.xlu0 %1246, %v373_v46   ;;  %398 = vperm.xlu1 %1247, %v372_v47  }
  0x42   :  { %393 = vperm.xlu0 %1246, %v371_v48   ;;  %388 = vperm.xlu1 %1247, %v370_v49  }
  0x7f   :  { %v138_v57 = vpop.permute.xlu0 %137 }
  0x80   :  { %v128_v59 = vpop.permute.xlu1 %127 }
  0x83   :  { %v133_v62 = vpop.permute.xlu0 %132 }
  0x84   :  { %v123_v0 = vpop.permute.xlu1 %122 }
  0x87   :  { %v118_v3 = vpop.permute.xlu0 %117 }
  0x88   :  { %v113_v5 = vpop.permute.xlu1 %112 }
  0x8d   :  { %v108_v9 = vpop.permute.xlu0 %107  ;;  %v103_v13 = vpop.permute.xlu1 %102 }
  0x91   :  { %v98_v16 = vpop.permute.xlu0 %97  ;;  %v93_v18 = vpop.permute.xlu1 %92 }
  0x95   :  { %v88_v21 = vpop.permute.xlu0 %87  ;;  %v83_v24 = vpop.permute.xlu1 %82 }
  0x99   :  { %v78_v29 = vpop.permute.xlu0 %77  ;;  %v73_v32 = vpop.permute.xlu1 %72 }
  0x9d   :  { %v68_v37 = vpop.permute.xlu0 %67  ;;  %v63_v40 = vpop.permute.xlu1 %62 }
  0xc4   :  { %v1544_v51 = vpop.f32.mrf.mxu0 }
  0xc5   :  { %v265_v38 = vadd.f32 %v1544_v51, %v68_v37  ;;  %v355_v51 = vld [vmem:[%s1792_s3 + $0x8] sm:$0xff] }
  0xc6   :  { %v1546_v52 = vpop.f32.mrf.mxu0 }
  0xc7   :  { %v260_v41 = vadd.f32 %v1546_v52, %v63_v40  ;;  %v356_v52 = vld [vmem:[%s1792_s3 + $0x10] sm:$0xff] }
  0xc8   :  { %v1076_v53 = vpop.f32.mrf.mxu0 }
  0xc9   :  { %v275_v33 = vadd.f32 %v1076_v53, %v78_v29  ;;  %v357_v53 = vld [vmem:[%s1792_s3 + $0x18] sm:$0xff] }
  0xca   :  { %v1548_v54 = vpop.f32.mrf.mxu0 }
  0xcb   :  { %v270_v35 = vadd.f32 %v1548_v54, %v73_v32  ;;  %v358_v54 = vld [vmem:[%s1792_s3 + $0x20] sm:$0xff] }
  0xcc   :  { %v1079_v55 = vpop.f32.mrf.mxu0 }
  0xcd   :  { %v285_v27 = vadd.f32 %v1079_v55, %v88_v21  ;;  %v359_v55 = vld [vmem:[%s1792_s3 + $0x28] sm:$0xff] }
  0xce   :  { %v279_v56 = vpop.f32.mrf.mxu0 }
  0xcf   :  { %v280_v30 = vadd.f32 %v279_v56, %v83_v24  ;;  %v360_v56 = vld [vmem:[%s1792_s3 + $0x30] sm:$0xff] }
  0xd0   :  { %v1082_v58 = vpop.f32.mrf.mxu0 }
  0xd1   :  { %v295_v22 = vadd.f32 %v1082_v58, %v98_v16  ;;  %v362_v58 = vld [vmem:[%s1792_s3 + $0x40] sm:$0xff] }
  0xd2   :  { %v289_v60 = vpop.f32.mrf.mxu0 }
  0xd3   :  { %v290_v25 = vadd.f32 %v289_v60, %v93_v18  ;;  %v364_v60 = vld [vmem:[%s1792_s3 + $0x50] sm:$0xff] }
  0xd4   :  { %v1085_v61 = vpop.f32.mrf.mxu0 }
  0xd5   :  { %v305_v19 = vadd.f32 %v1085_v61, %v108_v9  ;;  %v365_v61 = vld [vmem:[%s1792_s3 + $0x58] sm:$0xff]  ;;  %v459_v9 = vpop.permute.xlu1 %458 }
  0xd6   :  { %v299_v63 = vpop.f32.mrf.mxu0 }
  0xd7   :  { %v300_v20 = vadd.f32 %v299_v63, %v103_v13  ;;  %v367_v63 = vld [vmem:[%s1792_s3 + $0x68] sm:$0xff] }
  0xd8   :  { %v1088_v1 = vpop.f32.mrf.mxu0 }
  0xd9   :  { %v315_v15 = vadd.f32 %v1088_v1, %v118_v3  ;;  %v369_v1 = vld [vmem:[%s1792_s3 + $0x78] sm:$0xff] }
  0xda   :  { %v309_v2 = vpop.f32.mrf.mxu0 }
  0xdb   :  { %v310_v17 = vadd.f32 %v309_v2, %v113_v5  ;;  %v691_v2 = vld [vmem:[%s1794_s5] sm:$0xff] }
  0xdc   :  { %v1091_v4 = vpop.f32.mrf.mxu0  ;;  %1183 = vmatprep.mubr.f32.mxu0 %v691_v2 }
  0xdd   :  { %v325_v11 = vadd.f32 %v1091_v4, %v128_v59  ;;  %v363_v59 = vld [vmem:[%s1792_s3 + $0x48] sm:$0xff] }
  0xde   :  { %v319_v6 = vpop.f32.mrf.mxu0 }
  0xdf   :  { %v320_v14 = vadd.f32 %v319_v6, %v123_v0  ;;  %v368_v0 = vld [vmem:[%s1792_s3 + $0x70] sm:$0xff] }
  0xe0   :  { %v1094_v7 = vpop.f32.mrf.mxu0 }
  0xe1   :  { %v335_v8 = vadd.f32 %v1094_v7, %v138_v57  ;;  %v361_v57 = vld [vmem:[%s1792_s3 + $0x38] sm:$0xff]  ;;  %v464_v7 = vpop.permute.xlu0 %463 }
  0xe2   :  { %v329_v10 = vpop.f32.mrf.mxu0 }
  0xe3   :  { %1248 = vtanh.f32 %v335_v8  ;;  %v330_v12 = vadd.f32 %v329_v10, %v133_v62  ;;  %v366_v62 = vld [vmem:[%s1792_s3 + $0x60] sm:$0xff] }
  0xe5   :  { %1250 = vtanh.f32 %v330_v12  ;;  %v454_v12 = vpop.permute.xlu0 %453 }
  0xe6   :  { %1252 = vtanh.f32 %v325_v11 }
  0xe7   :  { %1254 = vtanh.f32 %v320_v14  ;;  %v449_v14 = vpop.permute.xlu1 %448 }
  0xe8   :  { %1256 = vtanh.f32 %v315_v15 }
  0xe9   :  { %1258 = vtanh.f32 %v310_v17  ;;  %v444_v17 = vpop.permute.xlu0 %443 }
  0xea   :  { %1260 = vtanh.f32 %v305_v19 }
  0xeb   :  { %1262 = vtanh.f32 %v300_v20  ;;  %v439_v19 = vpop.permute.xlu1 %438 }
  0xec   :  { %1264 = vtanh.f32 %v295_v22 }
  0xed   :  { %1266 = vtanh.f32 %v290_v25  ;;  %v434_v22 = vpop.permute.xlu0 %433 }
  0xee   :  { %1268 = vtanh.f32 %v285_v27 }
  0xef   :  { %1270 = vtanh.f32 %v280_v30  ;;  %v429_v27 = vpop.permute.xlu1 %428 }
  0xf0   :  { %v1550_v23 = vpop.eup %1248  ;;  %1272 = vtanh.f32 %v275_v33 }
  0xf1   :  { %1095 = vmatprep.subr.mxu1 %v1550_v23  ;;  %1274 = vtanh.f32 %v270_v35 }
  0xf2   :  { %v1553_v26 = vpop.eup %1250  ;;  %1096 = vmatpush3.msra.mxu1 %v1550_v23  ;;  %1276 = vtanh.f32 %v265_v38  ;;  %v424_v38 = vpop.permute.xlu0 %423 }
  0xf3   :  { %1097 = vmatprep.subr.mxu1 %v1553_v26  ;;  %v1557_v28 = vpop.eup %1252  ;;  %1278 = vtanh.f32 %v260_v41  ;;  %v419_v41 = vpop.permute.xlu1 %418 }
  0xf4   :  { %1098 = vmatpush3.msra.mxu1 %v1553_v26  ;;  %v1561_v31 = vpop.eup %1254 }
  0xf5   :  { %1099 = vmatprep.subr.mxu1 %v1557_v28  ;;  %v1565_v34 = vpop.eup %1256 }
  0xf6   :  { %1100 = vmatpush3.msra.mxu1 %v1557_v28  ;;  %v1570_v36 = vpop.eup %1258 }
  0xf7   :  { %1101 = vmatprep.subr.mxu1 %v1561_v31  ;;  %v1575_v39 = vpop.eup %1260 }
  0xf8   :  { %1102 = vmatpush3.msra.mxu1 %v1561_v31  ;;  %v1580_v42 = vpop.eup %1262 }
  0xf9   :  { %1103 = vmatprep.subr.mxu1 %v1565_v34  ;;  %v1584_v43 = vpop.eup %1264 }
  0xfa   :  { %1104 = vmatpush3.msra.mxu1 %v1565_v34  ;;  %v1588_v44 = vpop.eup %1266 }
  0xfb   :  { %1105 = vmatprep.subr.mxu1 %v1570_v36  ;;  %v1592_v45 = vpop.eup %1268 }
  0xfc   :  { %1106 = vmatpush3.msra.mxu1 %v1570_v36  ;;  %v1596_v46 = vpop.eup %1270 }
  0xfd   :  { %1107 = vmatprep.subr.mxu1 %v1575_v39  ;;  %v1600_v47 = vpop.eup %1272 }
  0xfe   :  { %1108 = vmatpush3.msra.mxu1 %v1575_v39  ;;  %v1604_v48 = vpop.eup %1274 }
  0xff   :  { %1109 = vmatprep.subr.mxu1 %v1580_v42  ;;  %v1608_v49 = vpop.eup %1276 }
 0x100   :  { %1110 = vmatpush3.msra.mxu1 %v1580_v42  ;;  %v1612_v50 = vpop.eup %1278 }
 0x101   :  { %1111 = vmatprep.subr.mxu1 %v1584_v43 }
 0x102   :  { %1112 = vmatpush3.msra.mxu1 %v1584_v43 }
 0x103   :  { %1113 = vmatprep.subr.mxu1 %v1588_v44 }
 0x104   :  { %1114 = vmatpush3.msra.mxu1 %v1588_v44 }
 0x105   :  { %1115 = vmatprep.subr.mxu1 %v1592_v45 }
 0x106   :  { %1116 = vmatpush3.msra.mxu1 %v1592_v45 }
 0x107   :  { %1117 = vmatprep.subr.mxu1 %v1596_v46 }
 0x108   :  { %1118 = vmatpush3.msra.mxu1 %v1596_v46 }
 0x109   :  { %1119 = vmatprep.subr.mxu1 %v1600_v47 }
 0x10a   :  { %1120 = vmatpush3.msra.mxu1 %v1600_v47 }
 0x10b   :  { %1121 = vmatprep.subr.mxu1 %v1604_v48 }
 0x10c   :  { %1122 = vmatpush3.msra.mxu1 %v1604_v48 }
 0x10d   :  { %1123 = vmatprep.subr.mxu1 %v1608_v49 }
 0x10e   :  { %1124 = vmatpush3.msra.mxu1 %v1608_v49 }
 0x10f   :  { %1125 = vmatprep.subr.mxu1 %v1612_v50 }
 0x110   :  { %1126 = vmatpush3.msra.mxu1 %v1612_v50 }
 0x111   :  { %1128 = vmatmul.mubr.f32.vlgmr.msra.gmra.mxu1 %v355_v51 }
 0x112   :  { %1130 = vmatprep.mubr.f32.mxu1 %v356_v52 }
 0x115   :  { %1131 = vmatmul.mubr.f32.gmra.mxu1 %v357_v53  ;;  %v414_v53 = vpop.permute.xlu0 %413 }
 0x116   :  { %1133 = vmatprep.mubr.f32.mxu1 %v358_v54 }
 0x119   :  { %1134 = vmatmul.mubr.f32.gmra.mxu1 %v359_v55  ;;  %v409_v55 = vpop.permute.xlu1 %408 }
 0x11a   :  { %1136 = vmatprep.mubr.f32.mxu1 %v360_v56 }
 0x11d   :  { %1137 = vmatmul.mubr.f32.gmra.mxu1 %v361_v57 }
 0x11e   :  { %1139 = vmatprep.mubr.f32.mxu1 %v362_v58 }
 0x121   :  { %1140 = vmatmul.mubr.f32.gmra.mxu1 %v363_v59 }
 0x122   :  { %1142 = vmatprep.mubr.f32.mxu1 %v364_v60  ;;  %v404_v60 = vpop.permute.xlu0 %403 }
 0x125   :  { %1143 = vmatmul.mubr.f32.gmra.mxu1 %v365_v61 }
 0x126   :  { %1145 = vmatprep.mubr.f32.mxu1 %v366_v62 }
 0x129   :  { %1146 = vmatmul.mubr.f32.gmra.mxu1 %v367_v63 }
 0x12a   :  { %1148 = vmatprep.mubr.f32.mxu1 %v368_v0 }
 0x12d   :  { %1149 = vmatmul.mubr.f32.gmra.mxu1 %v369_v1  ;;  %v399_v1 = vpop.permute.xlu1 %398 }
 0x1d1   :  { %v1665_v3 = vpop.f32.mrf.mxu1 }
 0x1d3   :  { %v1667_v4 = vpop.f32.mrf.mxu1 }
 0x1d5   :  { %v1132_v5 = vpop.f32.mrf.mxu1 }
 0x1d6   :  { %v548_v2 = vadd.f32 %v1132_v5, %v404_v60 }
 0x1d7   :  { %v542_v6 = vpop.f32.mrf.mxu1 }
 0x1d9   :  { %v1135_v8 = vpop.f32.mrf.mxu1 }
 0x1da   :  { %v558_v58 = vadd.f32 %v1135_v8, %v414_v53 }
 0x1db   :  { %v552_v10 = vpop.f32.mrf.mxu1 }
 0x1dc   :  { %v553_v62 = vadd.f32 %v552_v10, %v409_v55 }
 0x1dd   :  { %v1138_v11 = vpop.f32.mrf.mxu1 }
 0x1de   :  { %v568_v54 = vadd.f32 %v1138_v11, %v424_v38 }
 0x1df   :  { %v562_v13 = vpop.f32.mrf.mxu1 }
 0x1e0   :  { %v563_v56 = vadd.f32 %v562_v13, %v419_v41 }
 0x1e1   :  { %v1141_v15 = vpop.f32.mrf.mxu1 }
 0x1e2   :  { %v578_v51 = vadd.f32 %v1141_v15, %v434_v22 }
 0x1e3   :  { %v572_v16 = vpop.f32.mrf.mxu1 }
 0x1e4   :  { %v573_v52 = vadd.f32 %v572_v16, %v429_v27  ;;  %v394_v16 = vpop.permute.xlu0 %393 }
 0x1e5   :  { %v1144_v18 = vpop.f32.mrf.mxu1  ;;  %v538_v10 = vadd.f32 %v1665_v3, %v394_v16  ;;  %v700_v16 = vld [vmem:[%s1794_s5 + $0x48] sm:$0xff] }
 0x1e6   :  { %v588_v35 = vadd.f32 %v1144_v18, %v444_v17 }
 0x1e7   :  { %v582_v20 = vpop.f32.mrf.mxu1 }
 0x1e8   :  { %v583_v40 = vadd.f32 %v582_v20, %v439_v19  ;;  %v389_v19 = vpop.permute.xlu1 %388 }
 0x1e9   :  { %v1147_v21 = vpop.f32.mrf.mxu1  ;;  %v533_v20 = vadd.f32 %v1667_v4, %v389_v19  ;;  %v705_v19 = vld [vmem:[%s1794_s5 + $0x70] sm:$0xff] }
 0x1ea   :  { %v598_v24 = vadd.f32 %v1147_v21, %v454_v12 }
 0x1eb   :  { %v592_v25 = vpop.f32.mrf.mxu1 }
 0x1ec   :  { %v593_v29 = vadd.f32 %v592_v25, %v449_v14  ;;  %1280 = vtanh.f32 %v598_v24  ;;  %v543_v14 = vadd.f32 %v542_v6, %v399_v1 }
 0x1ed   :  { %v1150_v30 = vpop.f32.mrf.mxu1 }
 0x1ee   :  { %v608_v32 = vadd.f32 %v1150_v30, %v464_v7 }
 0x1ef   :  { %v602_v33 = vpop.f32.mrf.mxu1 }
 0x1f0   :  { %1282 = vtanh.f32 %v608_v32  ;;  %v603_v37 = vadd.f32 %v602_v33, %v459_v9 }
 0x1f1   :  { %1284 = vtanh.f32 %v593_v29 }
 0x1f2   :  { %1286 = vtanh.f32 %v603_v37 }
 0x1f3   :  { %1288 = vtanh.f32 %v588_v35 }
 0x1f4   :  { %1290 = vtanh.f32 %v583_v40 }
 0x1f5   :  { %1292 = vtanh.f32 %v578_v51 }
 0x1f6   :  { %1294 = vtanh.f32 %v573_v52 }
 0x1f7   :  { %1296 = vtanh.f32 %v568_v54 }
 0x1f8   :  { %1298 = vtanh.f32 %v563_v56 }
 0x1f9   :  { %v1281_v57 = vpop.eup %1280  ;;  %1300 = vtanh.f32 %v558_v58 }
 0x1fa   :  { %v640_v11 = vmul.f32 %v1281_v57, %v1281_v57  ;;  %1302 = vtanh.f32 %v553_v62 }
 0x1fb   :  { %1304 = vtanh.f32 %v548_v2 }
 0x1fc   :  { %v656_v17 = vsub.f32 1.0, %v640_v11  ;;  %1306 = vtanh.f32 %v543_v14  ;;  %v694_v11 = vld [vmem:[%s1794_s5 + $0x18] sm:$0xff]  ;;  %v696_v14 = vld [vmem:[%s1794_s5 + $0x28] sm:$0xff] }
 0x1fd   :  { %v1283_v59 = vpop.eup %1282  ;;  %1308 = vtanh.f32 %v538_v10  ;;  %v701_v10 = vld [vmem:[%s1794_s5 + $0x50] sm:$0xff] }
 0x1fe   :  { %v1285_v61 = vpop.eup %1284  ;;  %v642_v63 = vmul.f32 %v1283_v59, %v1283_v59  ;;  %1310 = vtanh.f32 %v533_v20  ;;  %v706_v20 = vld [vmem:[%s1794_s5 + $0x78] sm:$0xff] }
 0x1ff   :  { %v1287_v0 = vpop.eup %1286  ;;  %v639_v8 = vmul.f32 %v1285_v61, %v1285_v61 }
 0x200   :  { %v658_v7 = vsub.f32 1.0, %v642_v63  ;;  %v641_v9 = vmul.f32 %v1287_v0, %v1287_v0  ;;  %v1289_v12 = vpop.eup %1288 }
 0x201   :  { %v1291_v15 = vpop.eup %1290  ;;  %v638_v18 = vmul.f32 %v1289_v12, %v1289_v12  ;;  %v655_v6 = vsub.f32 1.0, %v639_v8  ;;  %v695_v12 = vld [vmem:[%s1794_s5 + $0x20] sm:$0xff]  ;;  %v698_v8 = vld [vmem:[%s1794_s5 + $0x38] sm:$0xff] }
 0x202   :  { %1151 = vmatprep.subr.mxu0 %v658_v7  ;;  %v657_v13 = vsub.f32 1.0, %v641_v9  ;;  %v1293_v5 = vpop.eup %1292  ;;  %v637_v21 = vmul.f32 %v1291_v15, %v1291_v15  ;;  %v693_v9 = vld [vmem:[%s1794_s5 + $0x10] sm:$0xff]  ;;  %v699_v15 = vld [vmem:[%s1794_s5 + $0x40] sm:$0xff] }
 0x203   :  { %1152 = vmatpush3.msra.mxu0 %v658_v7  ;;  %v1295_v22 = vpop.eup %1294  ;;  %v654_v24 = vsub.f32 1.0, %v638_v18  ;;  %v636_v25 = vmul.f32 %v1293_v5, %v1293_v5  ;;  %v692_v7 = vld [vmem:[%s1794_s5 + $0x8] sm:$0xff]  ;;  %v703_v18 = vld [vmem:[%s1794_s5 + $0x60] sm:$0xff] }
 0x204   :  { %1153 = vmatprep.subr.mxu0 %v657_v13  ;;  %v1297_v3 = vpop.eup %1296  ;;  %v653_v27 = vsub.f32 1.0, %v637_v21  ;;  %v635_v29 = vmul.f32 %v1295_v22, %v1295_v22  ;;  %v704_v5 = vld [vmem:[%s1794_s5 + $0x68] sm:$0xff] }
 0x205   :  { %1154 = vmatpush3.msra.mxu0 %v657_v13  ;;  %v1299_v30 = vpop.eup %1298  ;;  %v652_v4 = vsub.f32 1.0, %v636_v25  ;;  %v634_v32 = vmul.f32 %v1297_v3, %v1297_v3  ;;  %v697_v13 = vld [vmem:[%s1794_s5 + $0x30] sm:$0xff] }
 0x206   :  { %1155 = vmatprep.subr.mxu0 %v656_v17  ;;  %v1301_v33 = vpop.eup %1300  ;;  %v651_v35 = vsub.f32 1.0, %v635_v29  ;;  %v633_v37 = vmul.f32 %v1299_v30, %v1299_v30 }
 0x207   :  { %1156 = vmatpush3.msra.mxu0 %v656_v17  ;;  %v1303_v38 = vpop.eup %1302  ;;  %v650_v40 = vsub.f32 1.0, %v634_v32  ;;  %v632_v41 = vmul.f32 %v1301_v33, %v1301_v33  ;;  %v702_v17 = vld [vmem:[%s1794_s5 + $0x58] sm:$0xff] }
 0x208   :  { %1157 = vmatprep.subr.mxu0 %v655_v6  ;;  %v1305_v51 = vpop.eup %1304  ;;  %v649_v52 = vsub.f32 1.0, %v633_v37  ;;  %v631_v53 = vmul.f32 %v1303_v38, %v1303_v38  ;;  %v674_v37 = vmul.f32 %v1550_v23, %v1550_v23 }
 0x209   :  { %1158 = vmatpush3.msra.mxu0 %v655_v6  ;;  %v1307_v54 = vpop.eup %1306  ;;  %v648_v55 = vsub.f32 1.0, %v632_v41  ;;  %v630_v56 = vmul.f32 %v1305_v51, %v1305_v51  ;;  %v1335_v6 = vmov 0.0   ;;  %v672_v51 = vmul.f32 %v1557_v28, %v1557_v28 }
 0x20a   :  { %1159 = vmatprep.subr.mxu0 %v654_v24  ;;  %v1309_v57 = vpop.eup %1308  ;;  %v647_v58 = vsub.f32 1.0, %v631_v53  ;;  %v629_v59 = vmul.f32 %v1307_v54, %v1307_v54  ;;  %1207 = vmatprep.subr.mxu1 %v1335_v6  ;;  %v671_v54 = vmul.f32 %v1561_v31, %v1561_v31  ;;  %v668_v31 = vmul.f32 %v1575_v39, %v1575_v39 }
 0x20b   :  { %1160 = vmatpush3.msra.mxu0 %v654_v24  ;;  %v1311_v60 = vpop.eup %1310  ;;  %v646_v61 = vsub.f32 1.0, %v630_v56  ;;  %v628_v62 = vmul.f32 %v1309_v57, %v1309_v57  ;;  %1239 = vmatprep.mubr.msk.f32.mxu1 %vm1336_vm2, %v1335_v6  ;;  %v688_v23 = vsub.f32 1.0, %v672_v51  ;;  %v665_v39 = vmul.f32 %v1588_v44, %v1588_v44 }
 0x20c   :  { %1161 = vmatprep.subr.mxu0 %v653_v27  ;;  %v645_v63 = vsub.f32 1.0, %v629_v59  ;;  %v627_v0 = vmul.f32 %v1311_v60, %v1311_v60  ;;  %v687_v60 = vsub.f32 1.0, %v671_v54  ;;  %v662_v44 = vmul.f32 %v1600_v47, %v1600_v47 }
 0x20d   :  { %1162 = vmatpush3.msra.mxu0 %v653_v27  ;;  %v644_v1 = vsub.f32 1.0, %v628_v62 }
 0x20e   :  { %1163 = vmatprep.subr.mxu0 %v652_v4  ;;  %v643_v2 = vsub.f32 1.0, %v627_v0 }
 0x20f   :  { %1164 = vmatpush3.msra.mxu0 %v652_v4 }
 0x210   :  { %1165 = vmatprep.subr.mxu0 %v651_v35 }
 0x211   :  { %1166 = vmatpush3.msra.mxu0 %v651_v35 }
 0x212   :  { %1167 = vmatprep.subr.mxu0 %v650_v40 }
 0x213   :  { %1168 = vmatpush3.msra.mxu0 %v650_v40  ;;  %v673_v40 = vmul.f32 %v1553_v26, %v1553_v26  ;;  %v669_v26 = vmul.f32 %v1570_v36, %v1570_v36  ;;  %v666_v36 = vmul.f32 %v1584_v43, %v1584_v43  ;;  %v663_v43 = vmul.f32 %v1596_v46, %v1596_v46 }
 0x214   :  { %1169 = vmatprep.subr.mxu0 %v649_v52  ;;  %v660_v46 = vmul.f32 %v1608_v49, %v1608_v49 }
 0x215   :  { %1170 = vmatpush3.msra.mxu0 %v649_v52  ;;  %v690_v52 = vsub.f32 1.0, %v674_v37  ;;  %v689_v56 = vsub.f32 1.0, %v673_v40  ;;  %v685_v0 = vsub.f32 1.0, %v669_v26 }
 0x216   :  { %1171 = vmatprep.subr.mxu0 %v648_v55 }
 0x217   :  { %1172 = vmatpush3.msra.mxu0 %v648_v55 }
 0x218   :  { %1173 = vmatprep.subr.mxu0 %v647_v58 }
 0x219   :  { %1174 = vmatpush3.msra.mxu0 %v647_v58  ;;  %v670_v58 = vmul.f32 %v1565_v34, %v1565_v34  ;;  %v667_v34 = vmul.f32 %v1580_v42, %v1580_v42  ;;  %v664_v42 = vmul.f32 %v1592_v45, %v1592_v45  ;;  %v661_v45 = vmul.f32 %v1604_v48, %v1604_v48 }
 0x21a   :  { %1175 = vmatprep.subr.mxu0 %v646_v61 }
 0x21b   :  { %1176 = vmatpush3.msra.mxu0 %v646_v61  ;;  %v686_v61 = vsub.f32 1.0, %v670_v58 }
 0x21c   :  { %1177 = vmatprep.subr.mxu0 %v645_v63 }
 0x21d   :  { %1178 = vmatpush3.msra.mxu0 %v645_v63 }
 0x21e   :  { %1179 = vmatprep.subr.mxu0 %v644_v1 }
 0x21f   :  { %1180 = vmatpush3.msra.mxu0 %v644_v1  ;;  %v684_v1 = vsub.f32 1.0, %v668_v31 }
 0x220   :  { %1181 = vmatprep.subr.mxu0 %v643_v2 }
 0x221   :  { %1182 = vmatpush3.msra.mxu0 %v643_v2 }
 0x222   :  { %1184 = vmatmul.mubr.f32.vlgmr.msra.gmra.mxu0 %v692_v7 }
 0x223   :  { %1186 = vmatprep.mubr.f32.mxu0 %v693_v9  ;;  %v683_v9 = vsub.f32 1.0, %v667_v34 }
 0x226   :  { %1187 = vmatmul.mubr.f32.gmra.mxu0 %v694_v11  ;;  %v682_v11 = vsub.f32 1.0, %v666_v36 }
 0x227   :  { %1189 = vmatprep.mubr.f32.mxu0 %v695_v12 }
 0x22a   :  { %1190 = vmatmul.mubr.f32.gmra.mxu0 %v696_v14 }
 0x22b   :  { %1192 = vmatprep.mubr.f32.mxu0 %v697_v13  ;;  %v681_v13 = vsub.f32 1.0, %v665_v39 }
 0x22e   :  { %1193 = vmatmul.mubr.f32.gmra.mxu0 %v698_v8  ;;  %v680_v8 = vsub.f32 1.0, %v664_v42 }
 0x22f   :  { %1195 = vmatprep.mubr.f32.mxu0 %v699_v15 }
 0x232   :  { %1196 = vmatmul.mubr.f32.gmra.mxu0 %v700_v16 }
 0x233   :  { %1198 = vmatprep.mubr.f32.mxu0 %v701_v10  ;;  %v679_v10 = vsub.f32 1.0, %v663_v43 }
 0x236   :  { %1199 = vmatmul.mubr.f32.gmra.mxu0 %v702_v17  ;;  %v678_v17 = vsub.f32 1.0, %v662_v44 }
 0x237   :  { %1201 = vmatprep.mubr.f32.mxu0 %v703_v18  ;;  %v659_v18 = vmul.f32 %v1612_v50, %v1612_v50 }
 0x23a   :  { %1202 = vmatmul.mubr.f32.gmra.mxu0 %v704_v5  ;;  %v677_v5 = vsub.f32 1.0, %v661_v45 }
 0x23b   :  { %1204 = vmatprep.mubr.f32.mxu0 %v705_v19  ;;  %v676_v19 = vsub.f32 1.0, %v660_v46 }
 0x23e   :  { %1205 = vmatmul.mubr.f32.gmra.mxu0 %v706_v20 }
 0x2e2   :  { %v1718_v21 = vpop.f32.mrf.mxu0 }
 0x2e3   :  { %v853_v49 = vmul.f32 %v1718_v21, %v676_v19 }
 0x2e4   :  { %v1720_v22 = vpop.f32.mrf.mxu0 }
 0x2e6   :  { %v1722_v24 = vpop.f32.mrf.mxu0 }
 0x2e7   :  { %v855_v48 = vmul.f32 %v1722_v24, %v678_v17  ;;  %v868_v24 = vld [vmem:[%s1795_s6] sm:$0xf] }
 0x2e8   :  { %v1724_v25 = vpop.f32.mrf.mxu0 }
 0x2e9   :  { %v854_v20 = vmul.f32 %v1724_v25, %v677_v5 }
 0x2ea   :  { %v1726_v3 = vpop.f32.mrf.mxu0 }
 0x2eb   :  { %v857_v16 = vmul.f32 %v1726_v3, %v680_v8  ;;  %v675_v3 = vsub.f32 1.0, %v659_v18 }
 0x2ec   :  { %v1728_v27 = vpop.f32.mrf.mxu0 }
 0x2ed   :  { %v856_v47 = vmul.f32 %v1728_v27, %v679_v10  ;;  %v852_v50 = vmul.f32 %v1720_v22, %v675_v3 }
 0x2ee   :  { %v1194_v29 = vpop.f32.mrf.mxu0 }
 0x2ef   :  { %v859_v14 = vmul.f32 %v1194_v29, %v682_v11 }
 0x2f0   :  { %v803_v30 = vpop.f32.mrf.mxu0 }
 0x2f1   :  { %v858_v15 = vmul.f32 %v803_v30, %v681_v13 }
 0x2f2   :  { %v1197_v4 = vpop.f32.mrf.mxu0 }
 0x2f3   :  { %v861_v7 = vmul.f32 %v1197_v4, %v684_v1 }
 0x2f4   :  { %v813_v32 = vpop.f32.mrf.mxu0 }
 0x2f5   :  { %v860_v12 = vmul.f32 %v813_v32, %v683_v9 }
 0x2f6   :  { %v1200_v33 = vpop.f32.mrf.mxu0 }
 0x2f7   :  { %v863_v63 = vmul.f32 %v1200_v33, %v686_v61 }
 0x2f8   :  { %v823_v35 = vpop.f32.mrf.mxu0 }
 0x2f9   :  { %v862_v2 = vmul.f32 %v823_v35, %v685_v0 }
 0x2fa   :  { %v1203_v38 = vpop.f32.mrf.mxu0 }
 0x2fb   :  { %v865_v28 = vmul.f32 %v1203_v38, %v688_v23 }
 0x2fc   :  { %v833_v41 = vpop.f32.mrf.mxu0 }
 0x2fd   :  { %v864_v62 = vmul.f32 %v833_v41, %v687_v60 }
 0x2fe   :  { %v1206_v53 = vpop.f32.mrf.mxu0 }
 0x2ff   :  { %v867_v55 = vmul.f32 %v1206_v53, %v690_v52 }
 0x300   :  { %v843_v57 = vpop.f32.mrf.mxu0 }
 0x301   :  { %v866_v59 = vmul.f32 %v843_v57, %v689_v56  ;;  %1208 = vmatpush3.msra.mxu1 %v867_v55 }
 0x302   :  { %1209 = vmatprep.subr.mxu1 %v1335_v6 }
 0x303   :  { %1210 = vmatpush3.msra.mxu1 %v866_v59 }
 0x304   :  { %1211 = vmatprep.subr.mxu1 %v1335_v6 }
 0x305   :  { %1212 = vmatpush3.msra.mxu1 %v865_v28 }
 0x306   :  { %1213 = vmatprep.subr.mxu1 %v1335_v6 }
 0x307   :  { %1214 = vmatpush3.msra.mxu1 %v864_v62 }
 0x308   :  { %1215 = vmatprep.subr.mxu1 %v1335_v6 }
 0x309   :  { %1216 = vmatpush3.msra.mxu1 %v863_v63 }
 0x30a   :  { %1217 = vmatprep.subr.mxu1 %v1335_v6 }
 0x30b   :  { %1218 = vmatpush3.msra.mxu1 %v862_v2 }
 0x30c   :  { %1219 = vmatprep.subr.mxu1 %v1335_v6 }
 0x30d   :  { %1220 = vmatpush3.msra.mxu1 %v861_v7 }
 0x30e   :  { %1221 = vmatprep.subr.mxu1 %v1335_v6 }
 0x30f   :  { %1222 = vmatpush3.msra.mxu1 %v860_v12 }
 0x310   :  { %1223 = vmatprep.subr.mxu1 %v1335_v6 }
 0x311   :  { %1224 = vmatpush3.msra.mxu1 %v859_v14 }
 0x312   :  { %1225 = vmatprep.subr.mxu1 %v1335_v6 }
 0x313   :  { %1226 = vmatpush3.msra.mxu1 %v858_v15 }
 0x314   :  { %1227 = vmatprep.subr.mxu1 %v1335_v6 }
 0x315   :  { %1228 = vmatpush3.msra.mxu1 %v857_v16 }
 0x316   :  { %1229 = vmatprep.subr.mxu1 %v1335_v6 }
 0x317   :  { %1230 = vmatpush3.msra.mxu1 %v856_v47 }
 0x318   :  { %1231 = vmatprep.subr.mxu1 %v1335_v6 }
 0x319   :  { %1232 = vmatpush3.msra.mxu1 %v855_v48 }
 0x31a   :  { %1233 = vmatprep.subr.mxu1 %v1335_v6 }
 0x31b   :  { %1234 = vmatpush3.msra.mxu1 %v854_v20 }
 0x31c   :  { %1235 = vmatprep.subr.mxu1 %v1335_v6 }
 0x31d   :  { %1236 = vmatpush3.msra.mxu1 %v853_v49 }
 0x31e   :  { %1237 = vmatprep.subr.mxu1 %v1335_v6 }
 0x31f   :  { %1238 = vmatpush3.msra.mxu1 %v852_v50 }
 0x320   :  { %1240 = vmatmul.mubr.f32.vlgmr.msra.gmra.mxu1 %v868_v24 }
 0x3e0   :  { %v935_v25 = vpop.f32.mrf.mxu1 }
 0x3e1   :  { %939 = vst [vmem:[#allocation2] sm:$0xf] %v935_v25 }
 0x3e2   :  { %v1241_v21 = vpop.f32.mrf.mxu1 }
 0x3e3   :  { %1323 = shalt.err (!%p1320_p4)
}
 0x3e4   :  { %949 = dma.vmem_to_hbm [thread:$0]  %s947_s8, 64, %s1796_s7, [#allocation3]  }
 0x3e5   :  { %1332 = dma.done.wait [#allocation3], 64  }
 0x3e6   :  { %1333 = vsyncadd [#allocation3], 4294967232 }
 0x3e7   :  { %953 = vsyncpa [#allocation3], 1 }

</bundles_post_ra>
